<compile_context>
chip_gen: v7x
topology: tpu7x:2x2x1
jax: 0.10.0
libtpu: 0.0.40
codegen_flags: <defaults>
</compile_context>

<pallas_src>
import functools

import jax
import jax.numpy as jnp
from jax import lax
from jax.experimental import pallas as pl
from jax.experimental.pallas import tpu as pltpu


_PADL = 8  # left halo pad (columns) in the conv2 scratch; sublane-aligned (f32)


# ------------------------------- Fused kernel --------------------------------


def _bottleneck_kernel(x_ref, w1_ref, b1_ref, w2_ref, b2_ref, w3_ref, b3_ref,
                       ws_ref, bs_ref, o_ref, h1_ref, *, H, W, TH, cdt):
    """One image per grid step: conv1 -> conv2(3x3) -> conv3 + shortcut."""
    Cb = w1_ref.shape[1]

    # ---- conv1 (1x1, BN scale folded into w1) + bias + ReLU, whole image ----
    h1 = jnp.dot(x_ref[0], w1_ref[...], preferred_element_type=jnp.float32)
    h1 = jnp.maximum(h1 + b1_ref[...], 0.0)                      # (H, W, Cb) f32

    # Zero-filled padded scratch for the 3x3 halo.  Interior is stored at
    # rows [1, H+1) and columns [_PADL, _PADL+W) -> the store is sublane
    # aligned; the 1-px halo around it stays zero.
    h1_ref[...] = jnp.zeros_like(h1_ref)
    h1_ref[1:H + 1, _PADL:_PADL + W, :] = h1

    # ---- conv2 (3x3) + conv3 (1x1) + shortcut + add + ReLU, per row strip ----
    n_strips = H // TH
    for s in range(n_strips):              # static loop; TH*W rows per matmul
        h0 = s * TH
        acc = jnp.zeros((TH, W, Cb), jnp.float32)
        for dy in range(3):
            for dx in range(3):
                tap = h1_ref[h0 + dy:h0 + dy + TH,
                             _PADL - 1 + dx:_PADL - 1 + dx + W, :]
                acc = acc + jnp.dot(tap.astype(cdt), w2_ref[3 * dy + dx],
                                    preferred_element_type=jnp.float32)
        h2 = jnp.maximum(acc + b2_ref[...], 0.0).astype(cdt)     # (TH, W, Cb)

        # conv3 (1x1) + bias, plus the shortcut 1x1 conv on the same x rows
        # (fused: no extra HBM write/read for the residual).
        y = jnp.dot(h2, w3_ref[...], preferred_element_type=jnp.float32)
        y = y + b3_ref[...]
        y = y + jnp.dot(x_ref[0, h0:h0 + TH], ws_ref[...],
                        preferred_element_type=jnp.float32) + bs_ref[...]
        o_ref[0, h0:h0 + TH] = jnp.maximum(y, 0.0).astype(o_ref.dtype)


# ------------------------------- Module forward -------------------------------


def bottleneck_block_forward(x_nchw, params, *, compute_dtype=jnp.bfloat16,
                             tile_h=8):
    """BottleneckBlock.forward (stride=1, groups=1, dilation=1), NCHW in/out."""
    N, Cin, H, W = x_nchw.shape
    cdt = compute_dtype
    x = jnp.transpose(x_nchw, (0, 2, 3, 1)).astype(cdt)          # NCHW -> NHWC

    w1 = params["w1"].astype(cdt)
    w2 = params["w2"].astype(cdt)
    w3 = params["w3"].astype(cdt)
    Cb = w1.shape[1]
    Cout = w3.shape[1]

    if params.get("ws") is not None:
        ws = params["ws"].astype(cdt)
        bs = params["bs"].astype(jnp.float32).reshape(1, Cout)
    else:
        # Identity shortcut (in_channels == out_channels): exact identity matmul.
        ws = jnp.eye(Cin, Cout, dtype=cdt)
        bs = jnp.zeros((1, Cout), jnp.float32)

    b1 = params["b1"].astype(jnp.float32).reshape(1, Cb)
    b2 = params["b2"].astype(jnp.float32).reshape(1, Cb)
    b3 = params["b3"].astype(jnp.float32).reshape(1, Cout)

    TH = tile_h if (H % tile_h == 0) else H                      # row-strip size
    kernel = functools.partial(_bottleneck_kernel, H=H, W=W, TH=TH, cdt=cdt)

    out = pl.pallas_call(
        kernel,
        out_shape=jax.ShapeDtypeStruct((N, H, W, Cout), x_nchw.dtype),
        grid=(N,),
        in_specs=[
            pl.BlockSpec((1, H, W, Cin), lambda n: (n, 0, 0, 0)),
            pl.BlockSpec((Cin, Cb), lambda n: (0, 0)),
            pl.BlockSpec((1, Cb), lambda n: (0, 0)),
            pl.BlockSpec((9, Cb, Cb), lambda n: (0, 0, 0)),
            pl.BlockSpec((1, Cb), lambda n: (0, 0)),
            pl.BlockSpec((Cb, Cout), lambda n: (0, 0)),
            pl.BlockSpec((1, Cout), lambda n: (0, 0)),
            pl.BlockSpec((Cin, Cout), lambda n: (0, 0)),
            pl.BlockSpec((1, Cout), lambda n: (0, 0)),
        ],
        out_specs=pl.BlockSpec((1, H, W, Cout), lambda n: (n, 0, 0, 0)),
        scratch_shapes=[pltpu.VMEM((H + 2, W + _PADL + 1, Cb), jnp.float32)],
        compiler_params=pltpu.CompilerParams(
            dimension_semantics=("parallel",),        # both TCs busy on v7x
            vmem_limit_bytes=48 * 1024 * 1024),       # explicit scoped-VMEM budget
    )(x, w1, b1, w2, b2, w3, b3, ws, bs)

    return jnp.transpose(out, (0, 3, 1, 2)).astype(x_nchw.dtype)  # NHWC -> NCHW


# ---------------------------- Parameter construction --------------------------


def _fold_bn(gamma, beta, mean, var, eps=1e-5):
    scale = gamma / jnp.sqrt(var + eps)
    bias = beta - mean * scale
    return scale, bias


def make_params(key, in_channels, bottleneck_channels, out_channels):
    ks = jax.random.split(key, 8)
    ci, cb, co = in_channels, bottleneck_channels, out_channels

    def bn_params(k, c):
        k1, k2, k3, k4 = jax.random.split(k, 4)
        gamma = 0.5 + jax.random.uniform(k1, (c,), jnp.float32)
        beta = 0.1 * jax.random.normal(k2, (c,), jnp.float32)
        mean = 0.1 * jax.random.normal(k3, (c,), jnp.float32)
        var = 0.5 + jax.random.uniform(k4, (c,), jnp.float32)
        return gamma, beta, mean, var

    # Raw conv weights (PyTorch OIHW convention), MSRA-ish scale.
    w1_oihw = 0.1 * jax.random.normal(ks[0], (cb, ci, 1, 1), jnp.float32)
    w2_oihw = 0.1 * jax.random.normal(ks[1], (cb, cb, 3, 3), jnp.float32)
    w3_oihw = 0.1 * jax.random.normal(ks[2], (co, cb, 1, 1), jnp.float32)
    ws_oihw = 0.1 * jax.random.normal(ks[3], (co, ci, 1, 1), jnp.float32)

    bn1 = bn_params(ks[4], cb)
    bn2 = bn_params(ks[5], cb)
    bn3 = bn_params(ks[6], co)
    bns = bn_params(ks[7], co)

    s1, b1 = _fold_bn(*bn1)
    s2, b2 = _fold_bn(*bn2)
    s3, b3 = _fold_bn(*bn3)
    ss, bs = _fold_bn(*bns)

    # Fold the BN scale into the conv weights (output-channel axis) so the
    # kernel only adds a bias.
    w1 = w1_oihw[:, :, 0, 0].T * s1[None, :]                            # (Cin, Cb)
    w2 = (jnp.transpose(w2_oihw, (2, 3, 1, 0))                          # HWIO
          * s2[None, None, None, :]).reshape(9, cb, cb)                 # (9, Cb, Cb)
    w3 = w3_oihw[:, :, 0, 0].T * s3[None, :]                            # (Cb, Cout)
    ws = ws_oihw[:, :, 0, 0].T * ss[None, :]                            # (Cin, Cout)

    params = dict(w1=w1, w2=w2, w3=w3, ws=ws, b1=b1, b2=b2, b3=b3, bs=bs)
    raw = dict(w1=w1_oihw, w2=w2_oihw, w3=w3_oihw, ws=ws_oihw,
               bn1=bn1, bn2=bn2, bn3=bn3, bns=bns)
    return params, raw


# ------------------------------ Pure-JAX reference ----------------------------


def reference_forward(x_nchw, raw):
    def conv(x, w_oihw, stride=1, pad=0):
        return lax.conv_general_dilated(
            x, w_oihw, (stride, stride), [(pad, pad), (pad, pad)],
            dimension_numbers=("NCHW", "OIHW", "NCHW"))

    def bn(x, gbmv, eps=1e-5):
        gamma, beta, mean, var = gbmv
        s = gamma / jnp.sqrt(var + eps)
        b = beta - mean * s
        return x * s[None, :, None, None] + b[None, :, None, None]

    out = jax.nn.relu(bn(conv(x_nchw, raw["w1"]), raw["bn1"]))
    out = jax.nn.relu(bn(conv(out, raw["w2"], pad=1), raw["bn2"]))
    out = bn(conv(out, raw["w3"]), raw["bn3"])
    shortcut = bn(conv(x_nchw, raw["ws"]), raw["bns"])
    return jax.nn.relu(out + shortcut)


# ----------------------------------- main --------------------------------------

if __name__ == "__main__":
    N, Cin, H, W = 2, 4, 16, 16
    Cb, Cout = 8, 16

    key = jax.random.PRNGKey(0)
    k_x, k_p = jax.random.split(key)
    x = jax.random.normal(k_x, (N, Cin, H, W), jnp.float32)
    params, raw = make_params(k_p, Cin, Cb, Cout)

    fwd = jax.jit(bottleneck_block_forward)
    out = jax.block_until_ready(fwd(x, params))
    ref = jax.block_until_ready(reference_forward(x, raw))

    assert out.shape == (N, Cout, H, W), out.shape
    err = float(jnp.max(jnp.abs(out - ref)))
    # bf16 activations/weights with f32 accumulation -> relaxed tolerance.
    assert err < 3e-2, f"max abs error {err}"

    print("KERNEL_OK")
</pallas_src>

<mosaic_0001>
module attributes {stable_mosaic.version = 11 : i64} {
  func.func @_bottleneck_kernel(%arg0: i32, %arg1: memref<1x16x16x4xbf16, #tpu.memory_space<vmem>>, %arg2: memref<4x8xbf16, #tpu.memory_space<vmem>>, %arg3: memref<1x8xf32, #tpu.memory_space<vmem>>, %arg4: memref<9x8x8xbf16, #tpu.memory_space<vmem>>, %arg5: memref<1x8xf32, #tpu.memory_space<vmem>>, %arg6: memref<8x16xbf16, #tpu.memory_space<vmem>>, %arg7: memref<1x16xf32, #tpu.memory_space<vmem>>, %arg8: memref<4x16xbf16, #tpu.memory_space<vmem>>, %arg9: memref<1x16xf32, #tpu.memory_space<vmem>>, %arg10: memref<1x16x16x16xf32, #tpu.memory_space<vmem>>, %arg11: memref<18x25x8xf32, #tpu.memory_space<vmem>>) attributes {dimension_semantics = [#tpu.dimension_semantics<parallel>], iteration_bounds = array<i64: 2>, scalar_prefetch = 0 : i64, scratch_operands = 1 : i64, tpu.core_type = #tpu.core_type<tc>, window_params = [{transform_indices = @transform_0, window_bounds = array<i64: 1, 16, 16, 4>}, {pipeline_mode = #tpu.pipeline_mode<synchronous>, transform_indices = @transform_1, window_bounds = array<i64: 4, 8>}, {pipeline_mode = #tpu.pipeline_mode<synchronous>, transform_indices = @transform_2, window_bounds = array<i64: 1, 8>}, {pipeline_mode = #tpu.pipeline_mode<synchronous>, transform_indices = @transform_3, window_bounds = array<i64: 9, 8, 8>}, {pipeline_mode = #tpu.pipeline_mode<synchronous>, transform_indices = @transform_4, window_bounds = array<i64: 1, 8>}, {pipeline_mode = #tpu.pipeline_mode<synchronous>, transform_indices = @transform_5, window_bounds = array<i64: 8, 16>}, {pipeline_mode = #tpu.pipeline_mode<synchronous>, transform_indices = @transform_6, window_bounds = array<i64: 1, 16>}, {pipeline_mode = #tpu.pipeline_mode<synchronous>, transform_indices = @transform_7, window_bounds = array<i64: 4, 16>}, {pipeline_mode = #tpu.pipeline_mode<synchronous>, transform_indices = @transform_8, window_bounds = array<i64: 1, 16>}, {transform_indices = @transform_9, window_bounds = array<i64: 1, 16, 16, 16>}]} {
    %c0 = arith.constant 0 : index
    %c0_0 = arith.constant 0 : index
    %c0_1 = arith.constant 0 : index
    %c0_2 = arith.constant 0 : index
    %0 = vector.load %arg1[%c0, %c0_0, %c0_1, %c0_2] : memref<1x16x16x4xbf16, #tpu.memory_space<vmem>>, vector<1x16x16x4xbf16>
    %1 = vector.shape_cast %0 : vector<1x16x16x4xbf16> to vector<16x16x4xbf16>
    %c0_3 = arith.constant 0 : index
    %c0_4 = arith.constant 0 : index
    %2 = vector.load %arg2[%c0_3, %c0_4] : memref<4x8xbf16, #tpu.memory_space<vmem>>, vector<4x8xbf16>
    %cst = arith.constant dense<0.000000e+00> : vector<16x16x8xf32>
    %3 = tpu.matmul %1, %2, %cst {dimension_numbers = #tpu.dot_dimension_numbers<[2], [0], [0, 1], [1], [0, 0, 0, 1, 1, 1], [], []>} : vector<16x16x4xbf16>, vector<4x8xbf16>, vector<16x16x8xf32> -> vector<16x16x8xf32>
    %c0_5 = arith.constant 0 : index
    %c0_6 = arith.constant 0 : index
    %4 = vector.load %arg3[%c0_5, %c0_6] : memref<1x8xf32, #tpu.memory_space<vmem>>, vector<1x8xf32>
    %5 = vector.shape_cast %4 : vector<1x8xf32> to vector<1x1x8xf32>
    %6 = vector.broadcast %5 : vector<1x1x8xf32> to vector<16x16x8xf32>
    %7 = arith.addf %3, %6 : vector<16x16x8xf32>
    %cst_7 = arith.constant 0.000000e+00 : f32
    %8 = vector.broadcast %cst_7 : f32 to vector<16x16x8xf32>
    %9 = arith.maximumf %7, %8 : vector<16x16x8xf32>
    %cst_8 = arith.constant 0.000000e+00 : f32
    %10 = vector.broadcast %cst_8 : f32 to vector<18x25x8xf32>
    %c0_9 = arith.constant 0 : index
    %c0_10 = arith.constant 0 : index
    %c0_11 = arith.constant 0 : index
    %11 = vector.load %arg11[%c0_9, %c0_10, %c0_11] : memref<18x25x8xf32, #tpu.memory_space<vmem>>, vector<18x25x8xf32>
    tpu.vector_store %arg11[%c0_9, %c0_10, %c0_11], %10 {strides = array<i32>} : memref<18x25x8xf32, #tpu.memory_space<vmem>>, vector<18x25x8xf32>,
    %c1 = arith.constant 1 : index
    %c8 = arith.constant 8 : index
    %c0_12 = arith.constant 0 : index
    %12 = vector.load %arg11[%c1, %c8, %c0_12] : memref<18x25x8xf32, #tpu.memory_space<vmem>>, vector<16x16x8xf32>
    tpu.vector_store %arg11[%c1, %c8, %c0_12], %9 {strides = array<i32>} : memref<18x25x8xf32, #tpu.memory_space<vmem>>, vector<16x16x8xf32>,
    %cst_13 = arith.constant 0.000000e+00 : f32
    %13 = vector.broadcast %cst_13 : f32 to vector<8x16x8xf32>
    %c0_14 = arith.constant 0 : index
    %c7 = arith.constant 7 : index
    %c0_15 = arith.constant 0 : index
    %14 = vector.load %arg11[%c0_14, %c7, %c0_15] : memref<18x25x8xf32, #tpu.memory_space<vmem>>, vector<8x16x8xf32>
    %15 = arith.truncf %14 : vector<8x16x8xf32> to vector<8x16x8xbf16>
    %c0_16 = arith.constant 0 : index
    %c0_17 = arith.constant 0 : index
    %c0_18 = arith.constant 0 : index
    %16 = vector.load %arg4[%c0_16, %c0_17, %c0_18] : memref<9x8x8xbf16, #tpu.memory_space<vmem>>, vector<1x8x8xbf16>
    %17 = vector.shape_cast %16 : vector<1x8x8xbf16> to vector<8x8xbf16>
    %cst_19 = arith.constant dense<0.000000e+00> : vector<8x16x8xf32>
    %18 = tpu.matmul %15, %17, %cst_19 {dimension_numbers = #tpu.dot_dimension_numbers<[2], [0], [0, 1], [1], [0, 0, 0, 1, 1, 1], [], []>} : vector<8x16x8xbf16>, vector<8x8xbf16>, vector<8x16x8xf32> -> vector<8x16x8xf32>
    %19 = arith.addf %13, %18 : vector<8x16x8xf32>
    %c0_20 = arith.constant 0 : index
    %c8_21 = arith.constant 8 : index
    %c0_22 = arith.constant 0 : index
    %20 = vector.load %arg11[%c0_20, %c8_21, %c0_22] : memref<18x25x8xf32, #tpu.memory_space<vmem>>, vector<8x16x8xf32>
    %21 = arith.truncf %20 : vector<8x16x8xf32> to vector<8x16x8xbf16>
    %c1_23 = arith.constant 1 : index
    %c0_24 = arith.constant 0 : index
    %c0_25 = arith.constant 0 : index
    %22 = vector.load %arg4[%c1_23, %c0_24, %c0_25] : memref<9x8x8xbf16, #tpu.memory_space<vmem>>, vector<1x8x8xbf16>
    %23 = vector.shape_cast %22 : vector<1x8x8xbf16> to vector<8x8xbf16>
    %cst_26 = arith.constant dense<0.000000e+00> : vector<8x16x8xf32>
    %24 = tpu.matmul %21, %23, %cst_26 {dimension_numbers = #tpu.dot_dimension_numbers<[2], [0], [0, 1], [1], [0, 0, 0, 1, 1, 1], [], []>} : vector<8x16x8xbf16>, vector<8x8xbf16>, vector<8x16x8xf32> -> vector<8x16x8xf32>
    %25 = arith.addf %19, %24 : vector<8x16x8xf32>
    %c0_27 = arith.constant 0 : index
    %c9 = arith.constant 9 : index
    %c0_28 = arith.constant 0 : index
    %26 = vector.load %arg11[%c0_27, %c9, %c0_28] : memref<18x25x8xf32, #tpu.memory_space<vmem>>, vector<8x16x8xf32>
    %27 = arith.truncf %26 : vector<8x16x8xf32> to vector<8x16x8xbf16>
    %c2 = arith.constant 2 : index
    %c0_29 = arith.constant 0 : index
    %c0_30 = arith.constant 0 : index
    %28 = vector.load %arg4[%c2, %c0_29, %c0_30] : memref<9x8x8xbf16, #tpu.memory_space<vmem>>, vector<1x8x8xbf16>
    %29 = vector.shape_cast %28 : vector<1x8x8xbf16> to vector<8x8xbf16>
    %cst_31 = arith.constant dense<0.000000e+00> : vector<8x16x8xf32>
    %30 = tpu.matmul %27, %29, %cst_31 {dimension_numbers = #tpu.dot_dimension_numbers<[2], [0], [0, 1], [1], [0, 0, 0, 1, 1, 1], [], []>} : vector<8x16x8xbf16>, vector<8x8xbf16>, vector<8x16x8xf32> -> vector<8x16x8xf32>
    %31 = arith.addf %25, %30 : vector<8x16x8xf32>
    %c1_32 = arith.constant 1 : index
    %c7_33 = arith.constant 7 : index
    %c0_34 = arith.constant 0 : index
    %32 = vector.load %arg11[%c1_32, %c7_33, %c0_34] : memref<18x25x8xf32, #tpu.memory_space<vmem>>, vector<8x16x8xf32>
    %33 = arith.truncf %32 : vector<8x16x8xf32> to vector<8x16x8xbf16>
    %c3 = arith.constant 3 : index
    %c0_35 = arith.constant 0 : index
    %c0_36 = arith.constant 0 : index
    %34 = vector.load %arg4[%c3, %c0_35, %c0_36] : memref<9x8x8xbf16, #tpu.memory_space<vmem>>, vector<1x8x8xbf16>
    %35 = vector.shape_cast %34 : vector<1x8x8xbf16> to vector<8x8xbf16>
    %cst_37 = arith.constant dense<0.000000e+00> : vector<8x16x8xf32>
    %36 = tpu.matmul %33, %35, %cst_37 {dimension_numbers = #tpu.dot_dimension_numbers<[2], [0], [0, 1], [1], [0, 0, 0, 1, 1, 1], [], []>} : vector<8x16x8xbf16>, vector<8x8xbf16>, vector<8x16x8xf32> -> vector<8x16x8xf32>
    %37 = arith.addf %31, %36 : vector<8x16x8xf32>
    %c1_38 = arith.constant 1 : index
    %c8_39 = arith.constant 8 : index
    %c0_40 = arith.constant 0 : index
    %38 = vector.load %arg11[%c1_38, %c8_39, %c0_40] : memref<18x25x8xf32, #tpu.memory_space<vmem>>, vector<8x16x8xf32>
    %39 = arith.truncf %38 : vector<8x16x8xf32> to vector<8x16x8xbf16>
    %c4 = arith.constant 4 : index
    %c0_41 = arith.constant 0 : index
    %c0_42 = arith.constant 0 : index
    %40 = vector.load %arg4[%c4, %c0_41, %c0_42] : memref<9x8x8xbf16, #tpu.memory_space<vmem>>, vector<1x8x8xbf16>
    %41 = vector.shape_cast %40 : vector<1x8x8xbf16> to vector<8x8xbf16>
    %cst_43 = arith.constant dense<0.000000e+00> : vector<8x16x8xf32>
    %42 = tpu.matmul %39, %41, %cst_43 {dimension_numbers = #tpu.dot_dimension_numbers<[2], [0], [0, 1], [1], [0, 0, 0, 1, 1, 1], [], []>} : vector<8x16x8xbf16>, vector<8x8xbf16>, vector<8x16x8xf32> -> vector<8x16x8xf32>
    %43 = arith.addf %37, %42 : vector<8x16x8xf32>
    %c1_44 = arith.constant 1 : index
    %c9_45 = arith.constant 9 : index
    %c0_46 = arith.constant 0 : index
    %44 = vector.load %arg11[%c1_44, %c9_45, %c0_46] : memref<18x25x8xf32, #tpu.memory_space<vmem>>, vector<8x16x8xf32>
    %45 = arith.truncf %44 : vector<8x16x8xf32> to vector<8x16x8xbf16>
    %c5 = arith.constant 5 : index
    %c0_47 = arith.constant 0 : index
    %c0_48 = arith.constant 0 : index
    %46 = vector.load %arg4[%c5, %c0_47, %c0_48] : memref<9x8x8xbf16, #tpu.memory_space<vmem>>, vector<1x8x8xbf16>
    %47 = vector.shape_cast %46 : vector<1x8x8xbf16> to vector<8x8xbf16>
    %cst_49 = arith.constant dense<0.000000e+00> : vector<8x16x8xf32>
    %48 = tpu.matmul %45, %47, %cst_49 {dimension_numbers = #tpu.dot_dimension_numbers<[2], [0], [0, 1], [1], [0, 0, 0, 1, 1, 1], [], []>} : vector<8x16x8xbf16>, vector<8x8xbf16>, vector<8x16x8xf32> -> vector<8x16x8xf32>
    %49 = arith.addf %43, %48 : vector<8x16x8xf32>
    %c2_50 = arith.constant 2 : index
    %c7_51 = arith.constant 7 : index
    %c0_52 = arith.constant 0 : index
    %50 = vector.load %arg11[%c2_50, %c7_51, %c0_52] : memref<18x25x8xf32, #tpu.memory_space<vmem>>, vector<8x16x8xf32>
    %51 = arith.truncf %50 : vector<8x16x8xf32> to vector<8x16x8xbf16>
    %c6 = arith.constant 6 : index
    %c0_53 = arith.constant 0 : index
    %c0_54 = arith.constant 0 : index
    %52 = vector.load %arg4[%c6, %c0_53, %c0_54] : memref<9x8x8xbf16, #tpu.memory_space<vmem>>, vector<1x8x8xbf16>
    %53 = vector.shape_cast %52 : vector<1x8x8xbf16> to vector<8x8xbf16>
    %cst_55 = arith.constant dense<0.000000e+00> : vector<8x16x8xf32>
    %54 = tpu.matmul %51, %53, %cst_55 {dimension_numbers = #tpu.dot_dimension_numbers<[2], [0], [0, 1], [1], [0, 0, 0, 1, 1, 1], [], []>} : vector<8x16x8xbf16>, vector<8x8xbf16>, vector<8x16x8xf32> -> vector<8x16x8xf32>
    %55 = arith.addf %49, %54 : vector<8x16x8xf32>
    %c2_56 = arith.constant 2 : index
    %c8_57 = arith.constant 8 : index
    %c0_58 = arith.constant 0 : index
    %56 = vector.load %arg11[%c2_56, %c8_57, %c0_58] : memref<18x25x8xf32, #tpu.memory_space<vmem>>, vector<8x16x8xf32>
    %57 = arith.truncf %56 : vector<8x16x8xf32> to vector<8x16x8xbf16>
    %c7_59 = arith.constant 7 : index
    %c0_60 = arith.constant 0 : index
    %c0_61 = arith.constant 0 : index
    %58 = vector.load %arg4[%c7_59, %c0_60, %c0_61] : memref<9x8x8xbf16, #tpu.memory_space<vmem>>, vector<1x8x8xbf16>
    %59 = vector.shape_cast %58 : vector<1x8x8xbf16> to vector<8x8xbf16>
    %cst_62 = arith.constant dense<0.000000e+00> : vector<8x16x8xf32>
    %60 = tpu.matmul %57, %59, %cst_62 {dimension_numbers = #tpu.dot_dimension_numbers<[2], [0], [0, 1], [1], [0, 0, 0, 1, 1, 1], [], []>} : vector<8x16x8xbf16>, vector<8x8xbf16>, vector<8x16x8xf32> -> vector<8x16x8xf32>
    %61 = arith.addf %55, %60 : vector<8x16x8xf32>
    %c2_63 = arith.constant 2 : index
    %c9_64 = arith.constant 9 : index
    %c0_65 = arith.constant 0 : index
    %62 = vector.load %arg11[%c2_63, %c9_64, %c0_65] : memref<18x25x8xf32, #tpu.memory_space<vmem>>, vector<8x16x8xf32>
    %63 = arith.truncf %62 : vector<8x16x8xf32> to vector<8x16x8xbf16>
    %c8_66 = arith.constant 8 : index
    %c0_67 = arith.constant 0 : index
    %c0_68 = arith.constant 0 : index
    %64 = vector.load %arg4[%c8_66, %c0_67, %c0_68] : memref<9x8x8xbf16, #tpu.memory_space<vmem>>, vector<1x8x8xbf16>
    %65 = vector.shape_cast %64 : vector<1x8x8xbf16> to vector<8x8xbf16>
    %cst_69 = arith.constant dense<0.000000e+00> : vector<8x16x8xf32>
    %66 = tpu.matmul %63, %65, %cst_69 {dimension_numbers = #tpu.dot_dimension_numbers<[2], [0], [0, 1], [1], [0, 0, 0, 1, 1, 1], [], []>} : vector<8x16x8xbf16>, vector<8x8xbf16>, vector<8x16x8xf32> -> vector<8x16x8xf32>
    %67 = arith.addf %61, %66 : vector<8x16x8xf32>
    %c0_70 = arith.constant 0 : index
    %c0_71 = arith.constant 0 : index
    %68 = vector.load %arg5[%c0_70, %c0_71] : memref<1x8xf32, #tpu.memory_space<vmem>>, vector<1x8xf32>
    %69 = vector.shape_cast %68 : vector<1x8xf32> to vector<1x1x8xf32>
    %70 = vector.broadcast %69 : vector<1x1x8xf32> to vector<8x16x8xf32>
    %71 = arith.addf %67, %70 : vector<8x16x8xf32>
    %cst_72 = arith.constant 0.000000e+00 : f32
    %72 = vector.broadcast %cst_72 : f32 to vector<8x16x8xf32>
    %73 = arith.maximumf %71, %72 : vector<8x16x8xf32>
    %74 = arith.truncf %73 : vector<8x16x8xf32> to vector<8x16x8xbf16>
    %c0_73 = arith.constant 0 : index
    %c0_74 = arith.constant 0 : index
    %75 = vector.load %arg6[%c0_73, %c0_74] : memref<8x16xbf16, #tpu.memory_space<vmem>>, vector<8x16xbf16>
    %cst_75 = arith.constant dense<0.000000e+00> : vector<8x16x16xf32>
    %76 = tpu.matmul %74, %75, %cst_75 {dimension_numbers = #tpu.dot_dimension_numbers<[2], [0], [0, 1], [1], [0, 0, 0, 1, 1, 1], [], []>} : vector<8x16x8xbf16>, vector<8x16xbf16>, vector<8x16x16xf32> -> vector<8x16x16xf32>
    %c0_76 = arith.constant 0 : index
    %c0_77 = arith.constant 0 : index
    %77 = vector.load %arg7[%c0_76, %c0_77] : memref<1x16xf32, #tpu.memory_space<vmem>>, vector<1x16xf32>
    %78 = vector.shape_cast %77 : vector<1x16xf32> to vector<1x1x16xf32>
    %79 = vector.broadcast %78 : vector<1x1x16xf32> to vector<8x16x16xf32>
    %80 = arith.addf %76, %79 : vector<8x16x16xf32>
    %c0_78 = arith.constant 0 : index
    %c0_79 = arith.constant 0 : index
    %c0_80 = arith.constant 0 : index
    %c0_81 = arith.constant 0 : index
    %81 = vector.load %arg1[%c0_78, %c0_79, %c0_80, %c0_81] : memref<1x16x16x4xbf16, #tpu.memory_space<vmem>>, vector<1x8x16x4xbf16>
    %82 = vector.shape_cast %81 : vector<1x8x16x4xbf16> to vector<8x16x4xbf16>
    %c0_82 = arith.constant 0 : index
    %c0_83 = arith.constant 0 : index
    %83 = vector.load %arg8[%c0_82, %c0_83] : memref<4x16xbf16, #tpu.memory_space<vmem>>, vector<4x16xbf16>
    %cst_84 = arith.constant dense<0.000000e+00> : vector<8x16x16xf32>
    %84 = tpu.matmul %82, %83, %cst_84 {dimension_numbers = #tpu.dot_dimension_numbers<[2], [0], [0, 1], [1], [0, 0, 0, 1, 1, 1], [], []>} : vector<8x16x4xbf16>, vector<4x16xbf16>, vector<8x16x16xf32> -> vector<8x16x16xf32>
    %85 = arith.addf %80, %84 : vector<8x16x16xf32>
    %c0_85 = arith.constant 0 : index
    %c0_86 = arith.constant 0 : index
    %86 = vector.load %arg9[%c0_85, %c0_86] : memref<1x16xf32, #tpu.memory_space<vmem>>, vector<1x16xf32>
    %87 = vector.shape_cast %86 : vector<1x16xf32> to vector<1x1x16xf32>
    %88 = vector.broadcast %87 : vector<1x1x16xf32> to vector<8x16x16xf32>
    %89 = arith.addf %85, %88 : vector<8x16x16xf32>
    %cst_87 = arith.constant 0.000000e+00 : f32
    %90 = vector.broadcast %cst_87 : f32 to vector<8x16x16xf32>
    %91 = arith.maximumf %89, %90 : vector<8x16x16xf32>
    %c0_88 = arith.constant 0 : index
    %c0_89 = arith.constant 0 : index
    %c0_90 = arith.constant 0 : index
    %c0_91 = arith.constant 0 : index
    %92 = vector.load %arg10[%c0_88, %c0_89, %c0_90, %c0_91] : memref<1x16x16x16xf32, #tpu.memory_space<vmem>>, vector<1x8x16x16xf32>
    %93 = vector.shape_cast %92 : vector<1x8x16x16xf32> to vector<8x16x16xf32>
    %94 = vector.shape_cast %91 : vector<8x16x16xf32> to vector<1x8x16x16xf32>
    tpu.vector_store %arg10[%c0_88, %c0_89, %c0_90, %c0_91], %94 {strides = array<i32>} : memref<1x16x16x16xf32, #tpu.memory_space<vmem>>, vector<1x8x16x16xf32>,
    %cst_92 = arith.constant 0.000000e+00 : f32
    %95 = vector.broadcast %cst_92 : f32 to vector<8x16x8xf32>
    %c8_93 = arith.constant 8 : index
    %c7_94 = arith.constant 7 : index
    %c0_95 = arith.constant 0 : index
    %96 = vector.load %arg11[%c8_93, %c7_94, %c0_95] : memref<18x25x8xf32, #tpu.memory_space<vmem>>, vector<8x16x8xf32>
    %97 = arith.truncf %96 : vector<8x16x8xf32> to vector<8x16x8xbf16>
    %c0_96 = arith.constant 0 : index
    %c0_97 = arith.constant 0 : index
    %c0_98 = arith.constant 0 : index
    %98 = vector.load %arg4[%c0_96, %c0_97, %c0_98] : memref<9x8x8xbf16, #tpu.memory_space<vmem>>, vector<1x8x8xbf16>
    %99 = vector.shape_cast %98 : vector<1x8x8xbf16> to vector<8x8xbf16>
    %cst_99 = arith.constant dense<0.000000e+00> : vector<8x16x8xf32>
    %100 = tpu.matmul %97, %99, %cst_99 {dimension_numbers = #tpu.dot_dimension_numbers<[2], [0], [0, 1], [1], [0, 0, 0, 1, 1, 1], [], []>} : vector<8x16x8xbf16>, vector<8x8xbf16>, vector<8x16x8xf32> -> vector<8x16x8xf32>
    %101 = arith.addf %95, %100 : vector<8x16x8xf32>
    %c8_100 = arith.constant 8 : index
    %c8_101 = arith.constant 8 : index
    %c0_102 = arith.constant 0 : index
    %102 = vector.load %arg11[%c8_100, %c8_101, %c0_102] : memref<18x25x8xf32, #tpu.memory_space<vmem>>, vector<8x16x8xf32>
    %103 = arith.truncf %102 : vector<8x16x8xf32> to vector<8x16x8xbf16>
    %c1_103 = arith.constant 1 : index
    %c0_104 = arith.constant 0 : index
    %c0_105 = arith.constant 0 : index
    %104 = vector.load %arg4[%c1_103, %c0_104, %c0_105] : memref<9x8x8xbf16, #tpu.memory_space<vmem>>, vector<1x8x8xbf16>
    %105 = vector.shape_cast %104 : vector<1x8x8xbf16> to vector<8x8xbf16>
    %cst_106 = arith.constant dense<0.000000e+00> : vector<8x16x8xf32>
    %106 = tpu.matmul %103, %105, %cst_106 {dimension_numbers = #tpu.dot_dimension_numbers<[2], [0], [0, 1], [1], [0, 0, 0, 1, 1, 1], [], []>} : vector<8x16x8xbf16>, vector<8x8xbf16>, vector<8x16x8xf32> -> vector<8x16x8xf32>
    %107 = arith.addf %101, %106 : vector<8x16x8xf32>
    %c8_107 = arith.constant 8 : index
    %c9_108 = arith.constant 9 : index
    %c0_109 = arith.constant 0 : index
    %108 = vector.load %arg11[%c8_107, %c9_108, %c0_109] : memref<18x25x8xf32, #tpu.memory_space<vmem>>, vector<8x16x8xf32>
    %109 = arith.truncf %108 : vector<8x16x8xf32> to vector<8x16x8xbf16>
    %c2_110 = arith.constant 2 : index
    %c0_111 = arith.constant 0 : index
    %c0_112 = arith.constant 0 : index
    %110 = vector.load %arg4[%c2_110, %c0_111, %c0_112] : memref<9x8x8xbf16, #tpu.memory_space<vmem>>, vector<1x8x8xbf16>
    %111 = vector.shape_cast %110 : vector<1x8x8xbf16> to vector<8x8xbf16>
    %cst_113 = arith.constant dense<0.000000e+00> : vector<8x16x8xf32>
    %112 = tpu.matmul %109, %111, %cst_113 {dimension_numbers = #tpu.dot_dimension_numbers<[2], [0], [0, 1], [1], [0, 0, 0, 1, 1, 1], [], []>} : vector<8x16x8xbf16>, vector<8x8xbf16>, vector<8x16x8xf32> -> vector<8x16x8xf32>
    %113 = arith.addf %107, %112 : vector<8x16x8xf32>
    %c9_114 = arith.constant 9 : index
    %c7_115 = arith.constant 7 : index
    %c0_116 = arith.constant 0 : index
    %114 = vector.load %arg11[%c9_114, %c7_115, %c0_116] : memref<18x25x8xf32, #tpu.memory_space<vmem>>, vector<8x16x8xf32>
    %115 = arith.truncf %114 : vector<8x16x8xf32> to vector<8x16x8xbf16>
    %c3_117 = arith.constant 3 : index
    %c0_118 = arith.constant 0 : index
    %c0_119 = arith.constant 0 : index
    %116 = vector.load %arg4[%c3_117, %c0_118, %c0_119] : memref<9x8x8xbf16, #tpu.memory_space<vmem>>, vector<1x8x8xbf16>
    %117 = vector.shape_cast %116 : vector<1x8x8xbf16> to vector<8x8xbf16>
    %cst_120 = arith.constant dense<0.000000e+00> : vector<8x16x8xf32>
    %118 = tpu.matmul %115, %117, %cst_120 {dimension_numbers = #tpu.dot_dimension_numbers<[2], [0], [0, 1], [1], [0, 0, 0, 1, 1, 1], [], []>} : vector<8x16x8xbf16>, vector<8x8xbf16>, vector<8x16x8xf32> -> vector<8x16x8xf32>
    %119 = arith.addf %113, %118 : vector<8x16x8xf32>
    %c9_121 = arith.constant 9 : index
    %c8_122 = arith.constant 8 : index
    %c0_123 = arith.constant 0 : index
    %120 = vector.load %arg11[%c9_121, %c8_122, %c0_123] : memref<18x25x8xf32, #tpu.memory_space<vmem>>, vector<8x16x8xf32>
    %121 = arith.truncf %120 : vector<8x16x8xf32> to vector<8x16x8xbf16>
    %c4_124 = arith.constant 4 : index
    %c0_125 = arith.constant 0 : index
    %c0_126 = arith.constant 0 : index
    %122 = vector.load %arg4[%c4_124, %c0_125, %c0_126] : memref<9x8x8xbf16, #tpu.memory_space<vmem>>, vector<1x8x8xbf16>
    %123 = vector.shape_cast %122 : vector<1x8x8xbf16> to vector<8x8xbf16>
    %cst_127 = arith.constant dense<0.000000e+00> : vector<8x16x8xf32>
    %124 = tpu.matmul %121, %123, %cst_127 {dimension_numbers = #tpu.dot_dimension_numbers<[2], [0], [0, 1], [1], [0, 0, 0, 1, 1, 1], [], []>} : vector<8x16x8xbf16>, vector<8x8xbf16>, vector<8x16x8xf32> -> vector<8x16x8xf32>
    %125 = arith.addf %119, %124 : vector<8x16x8xf32>
    %c9_128 = arith.constant 9 : index
    %c9_129 = arith.constant 9 : index
    %c0_130 = arith.constant 0 : index
    %126 = vector.load %arg11[%c9_128, %c9_129, %c0_130] : memref<18x25x8xf32, #tpu.memory_space<vmem>>, vector<8x16x8xf32>
    %127 = arith.truncf %126 : vector<8x16x8xf32> to vector<8x16x8xbf16>
    %c5_131 = arith.constant 5 : index
    %c0_132 = arith.constant 0 : index
    %c0_133 = arith.constant 0 : index
    %128 = vector.load %arg4[%c5_131, %c0_132, %c0_133] : memref<9x8x8xbf16, #tpu.memory_space<vmem>>, vector<1x8x8xbf16>
    %129 = vector.shape_cast %128 : vector<1x8x8xbf16> to vector<8x8xbf16>
    %cst_134 = arith.constant dense<0.000000e+00> : vector<8x16x8xf32>
    %130 = tpu.matmul %127, %129, %cst_134 {dimension_numbers = #tpu.dot_dimension_numbers<[2], [0], [0, 1], [1], [0, 0, 0, 1, 1, 1], [], []>} : vector<8x16x8xbf16>, vector<8x8xbf16>, vector<8x16x8xf32> -> vector<8x16x8xf32>
    %131 = arith.addf %125, %130 : vector<8x16x8xf32>
    %c10 = arith.constant 10 : index
    %c7_135 = arith.constant 7 : index
    %c0_136 = arith.constant 0 : index
    %132 = vector.load %arg11[%c10, %c7_135, %c0_136] : memref<18x25x8xf32, #tpu.memory_space<vmem>>, vector<8x16x8xf32>
    %133 = arith.truncf %132 : vector<8x16x8xf32> to vector<8x16x8xbf16>
    %c6_137 = arith.constant 6 : index
    %c0_138 = arith.constant 0 : index
    %c0_139 = arith.constant 0 : index
    %134 = vector.load %arg4[%c6_137, %c0_138, %c0_139] : memref<9x8x8xbf16, #tpu.memory_space<vmem>>, vector<1x8x8xbf16>
    %135 = vector.shape_cast %134 : vector<1x8x8xbf16> to vector<8x8xbf16>
    %cst_140 = arith.constant dense<0.000000e+00> : vector<8x16x8xf32>
    %136 = tpu.matmul %133, %135, %cst_140 {dimension_numbers = #tpu.dot_dimension_numbers<[2], [0], [0, 1], [1], [0, 0, 0, 1, 1, 1], [], []>} : vector<8x16x8xbf16>, vector<8x8xbf16>, vector<8x16x8xf32> -> vector<8x16x8xf32>
    %137 = arith.addf %131, %136 : vector<8x16x8xf32>
    %c10_141 = arith.constant 10 : index
    %c8_142 = arith.constant 8 : index
    %c0_143 = arith.constant 0 : index
    %138 = vector.load %arg11[%c10_141, %c8_142, %c0_143] : memref<18x25x8xf32, #tpu.memory_space<vmem>>, vector<8x16x8xf32>
    %139 = arith.truncf %138 : vector<8x16x8xf32> to vector<8x16x8xbf16>
    %c7_144 = arith.constant 7 : index
    %c0_145 = arith.constant 0 : index
    %c0_146 = arith.constant 0 : index
    %140 = vector.load %arg4[%c7_144, %c0_145, %c0_146] : memref<9x8x8xbf16, #tpu.memory_space<vmem>>, vector<1x8x8xbf16>
    %141 = vector.shape_cast %140 : vector<1x8x8xbf16> to vector<8x8xbf16>
    %cst_147 = arith.constant dense<0.000000e+00> : vector<8x16x8xf32>
    %142 = tpu.matmul %139, %141, %cst_147 {dimension_numbers = #tpu.dot_dimension_numbers<[2], [0], [0, 1], [1], [0, 0, 0, 1, 1, 1], [], []>} : vector<8x16x8xbf16>, vector<8x8xbf16>, vector<8x16x8xf32> -> vector<8x16x8xf32>
    %143 = arith.addf %137, %142 : vector<8x16x8xf32>
    %c10_148 = arith.constant 10 : index
    %c9_149 = arith.constant 9 : index
    %c0_150 = arith.constant 0 : index
    %144 = vector.load %arg11[%c10_148, %c9_149, %c0_150] : memref<18x25x8xf32, #tpu.memory_space<vmem>>, vector<8x16x8xf32>
    %145 = arith.truncf %144 : vector<8x16x8xf32> to vector<8x16x8xbf16>
    %c8_151 = arith.constant 8 : index
    %c0_152 = arith.constant 0 : index
    %c0_153 = arith.constant 0 : index
    %146 = vector.load %arg4[%c8_151, %c0_152, %c0_153] : memref<9x8x8xbf16, #tpu.memory_space<vmem>>, vector<1x8x8xbf16>
    %147 = vector.shape_cast %146 : vector<1x8x8xbf16> to vector<8x8xbf16>
    %cst_154 = arith.constant dense<0.000000e+00> : vector<8x16x8xf32>
    %148 = tpu.matmul %145, %147, %cst_154 {dimension_numbers = #tpu.dot_dimension_numbers<[2], [0], [0, 1], [1], [0, 0, 0, 1, 1, 1], [], []>} : vector<8x16x8xbf16>, vector<8x8xbf16>, vector<8x16x8xf32> -> vector<8x16x8xf32>
    %149 = arith.addf %143, %148 : vector<8x16x8xf32>
    %c0_155 = arith.constant 0 : index
    %c0_156 = arith.constant 0 : index
    %150 = vector.load %arg5[%c0_155, %c0_156] : memref<1x8xf32, #tpu.memory_space<vmem>>, vector<1x8xf32>
    %151 = vector.shape_cast %150 : vector<1x8xf32> to vector<1x1x8xf32>
    %152 = vector.broadcast %151 : vector<1x1x8xf32> to vector<8x16x8xf32>
    %153 = arith.addf %149, %152 : vector<8x16x8xf32>
    %cst_157 = arith.constant 0.000000e+00 : f32
    %154 = vector.broadcast %cst_157 : f32 to vector<8x16x8xf32>
    %155 = arith.maximumf %153, %154 : vector<8x16x8xf32>
    %156 = arith.truncf %155 : vector<8x16x8xf32> to vector<8x16x8xbf16>
    %c0_158 = arith.constant 0 : index
    %c0_159 = arith.constant 0 : index
    %157 = vector.load %arg6[%c0_158, %c0_159] : memref<8x16xbf16, #tpu.memory_space<vmem>>, vector<8x16xbf16>
    %cst_160 = arith.constant dense<0.000000e+00> : vector<8x16x16xf32>
    %158 = tpu.matmul %156, %157, %cst_160 {dimension_numbers = #tpu.dot_dimension_numbers<[2], [0], [0, 1], [1], [0, 0, 0, 1, 1, 1], [], []>} : vector<8x16x8xbf16>, vector<8x16xbf16>, vector<8x16x16xf32> -> vector<8x16x16xf32>
    %c0_161 = arith.constant 0 : index
    %c0_162 = arith.constant 0 : index
    %159 = vector.load %arg7[%c0_161, %c0_162] : memref<1x16xf32, #tpu.memory_space<vmem>>, vector<1x16xf32>
    %160 = vector.shape_cast %159 : vector<1x16xf32> to vector<1x1x16xf32>
    %161 = vector.broadcast %160 : vector<1x1x16xf32> to vector<8x16x16xf32>
    %162 = arith.addf %158, %161 : vector<8x16x16xf32>
    %c0_163 = arith.constant 0 : index
    %c8_164 = arith.constant 8 : index
    %c0_165 = arith.constant 0 : index
    %c0_166 = arith.constant 0 : index
    %163 = vector.load %arg1[%c0_163, %c8_164, %c0_165, %c0_166] : memref<1x16x16x4xbf16, #tpu.memory_space<vmem>>, vector<1x8x16x4xbf16>
    %164 = vector.shape_cast %163 : vector<1x8x16x4xbf16> to vector<8x16x4xbf16>
    %c0_167 = arith.constant 0 : index
    %c0_168 = arith.constant 0 : index
    %165 = vector.load %arg8[%c0_167, %c0_168] : memref<4x16xbf16, #tpu.memory_space<vmem>>, vector<4x16xbf16>
    %cst_169 = arith.constant dense<0.000000e+00> : vector<8x16x16xf32>
    %166 = tpu.matmul %164, %165, %cst_169 {dimension_numbers = #tpu.dot_dimension_numbers<[2], [0], [0, 1], [1], [0, 0, 0, 1, 1, 1], [], []>} : vector<8x16x4xbf16>, vector<4x16xbf16>, vector<8x16x16xf32> -> vector<8x16x16xf32>
    %167 = arith.addf %162, %166 : vector<8x16x16xf32>
    %c0_170 = arith.constant 0 : index
    %c0_171 = arith.constant 0 : index
    %168 = vector.load %arg9[%c0_170, %c0_171] : memref<1x16xf32, #tpu.memory_space<vmem>>, vector<1x16xf32>
    %169 = vector.shape_cast %168 : vector<1x16xf32> to vector<1x1x16xf32>
    %170 = vector.broadcast %169 : vector<1x1x16xf32> to vector<8x16x16xf32>
    %171 = arith.addf %167, %170 : vector<8x16x16xf32>
    %cst_172 = arith.constant 0.000000e+00 : f32
    %172 = vector.broadcast %cst_172 : f32 to vector<8x16x16xf32>
    %173 = arith.maximumf %171, %172 : vector<8x16x16xf32>
    %c0_173 = arith.constant 0 : index
    %c8_174 = arith.constant 8 : index
    %c0_175 = arith.constant 0 : index
    %c0_176 = arith.constant 0 : index
    %174 = vector.load %arg10[%c0_173, %c8_174, %c0_175, %c0_176] : memref<1x16x16x16xf32, #tpu.memory_space<vmem>>, vector<1x8x16x16xf32>
    %175 = vector.shape_cast %174 : vector<1x8x16x16xf32> to vector<8x16x16xf32>
    %176 = vector.shape_cast %173 : vector<8x16x16xf32> to vector<1x8x16x16xf32>
    tpu.vector_store %arg10[%c0_173, %c8_174, %c0_175, %c0_176], %176 {strides = array<i32>} : memref<1x16x16x16xf32, #tpu.memory_space<vmem>>, vector<1x8x16x16xf32>,
    return
  }
  func.func @transform_0(%arg0: i32) -> (i32, i32, i32, i32) {
    %c0_i32 = arith.constant 0 : i32
    %c0_i32_0 = arith.constant 0 : i32
    %c0_i32_1 = arith.constant 0 : i32
    %c0_i32_2 = arith.constant 0 : i32
    return %arg0, %c0_i32, %c0_i32_0, %c0_i32_1 : i32, i32, i32, i32
  }
  func.func @transform_1(%arg0: i32) -> (i32, i32) {
    %c0_i32 = arith.constant 0 : i32
    %c0_i32_0 = arith.constant 0 : i32
    %c0_i32_1 = arith.constant 0 : i32
    return %c0_i32, %c0_i32_0 : i32, i32
  }
  func.func @transform_2(%arg0: i32) -> (i32, i32) {
    %c0_i32 = arith.constant 0 : i32
    %c0_i32_0 = arith.constant 0 : i32
    %c0_i32_1 = arith.constant 0 : i32
    return %c0_i32, %c0_i32_0 : i32, i32
  }
  func.func @transform_3(%arg0: i32) -> (i32, i32, i32) {
    %c0_i32 = arith.constant 0 : i32
    %c0_i32_0 = arith.constant 0 : i32
    %c0_i32_1 = arith.constant 0 : i32
    %c0_i32_2 = arith.constant 0 : i32
    return %c0_i32, %c0_i32_0, %c0_i32_1 : i32, i32, i32
  }
  func.func @transform_4(%arg0: i32) -> (i32, i32) {
    %c0_i32 = arith.constant 0 : i32
    %c0_i32_0 = arith.constant 0 : i32
    %c0_i32_1 = arith.constant 0 : i32
    return %c0_i32, %c0_i32_0 : i32, i32
  }
  func.func @transform_5(%arg0: i32) -> (i32, i32) {
    %c0_i32 = arith.constant 0 : i32
    %c0_i32_0 = arith.constant 0 : i32
    %c0_i32_1 = arith.constant 0 : i32
    return %c0_i32, %c0_i32_0 : i32, i32
  }
  func.func @transform_6(%arg0: i32) -> (i32, i32) {
    %c0_i32 = arith.constant 0 : i32
    %c0_i32_0 = arith.constant 0 : i32
    %c0_i32_1 = arith.constant 0 : i32
    return %c0_i32, %c0_i32_0 : i32, i32
  }
  func.func @transform_7(%arg0: i32) -> (i32, i32) {
    %c0_i32 = arith.constant 0 : i32
    %c0_i32_0 = arith.constant 0 : i32
    %c0_i32_1 = arith.constant 0 : i32
    return %c0_i32, %c0_i32_0 : i32, i32
  }
  func.func @transform_8(%arg0: i32) -> (i32, i32) {
    %c0_i32 = arith.constant 0 : i32
    %c0_i32_0 = arith.constant 0 : i32
    %c0_i32_1 = arith.constant 0 : i32
    return %c0_i32, %c0_i32_0 : i32, i32
  }
  func.func @transform_9(%arg0: i32) -> (i32, i32, i32, i32) {
    %c0_i32 = arith.constant 0 : i32
    %c0_i32_0 = arith.constant 0 : i32
    %c0_i32_1 = arith.constant 0 : i32
    %c0_i32_2 = arith.constant 0 : i32
    return %arg0, %c0_i32, %c0_i32_0, %c0_i32_1 : i32, i32, i32, i32
  }
}

</mosaic_0001>

<bundles_post_ra>
// kernel: bottleneck_block_forward.1
= control target key start
LH: loop header
LB: loop body
LE: loop exit
PB: predicated region body
PF: predicated region fallthrough
CT: control target
= control target key end

     0   :  { %s6029_s30 = smov 0   ;;  %s6993_s0 = inlined_call_operand.vmem [shape: bf16[2,16,16,4], index: 0, kind: input, shape index: {}]   ;;  %s6994_s1 = inlined_call_operand.vmem [shape: bf16[4,8], index: 1, kind: input, shape index: {}]   ;;  %s6995_s2 = inlined_call_operand.vmem [shape: f32[1,8], index: 2, kind: input, shape index: {}]   ;;  %s6996_s3 = inlined_call_operand.vmem [shape: bf16[9,8,8], index: 3, kind: input, shape index: {}]   ;;  %s6997_s4 = inlined_call_operand.vmem [shape: f32[1,8], index: 4, kind: input, shape index: {}]   ;;  %s6998_s5 = inlined_call_operand.vmem [shape: bf16[8,16], index: 5, kind: input, shape index: {}]   ;;  %s6999_s6 = inlined_call_operand.vmem [shape: f32[1,16], index: 6, kind: input, shape index: {}]   ;;  %s7000_s7 = inlined_call_operand.vmem [shape: bf16[4,16], index: 7, kind: input, shape index: {}]   ;;  %s7001_s8 = inlined_call_operand.vmem [shape: f32[1,16], index: 8, kind: input, shape index: {}]   ;;  %s7002_s9 = inlined_call_operand.vmem [shape: f32[2,16,16,16], index: 9, kind: output, shape index: {}]  }
   0x1 LB: > { %s4646_s10 = sadd.s32 4294967295, %s5976_s30   ;;  %p4650_p0 = scmp.ge.s32.totalorder %s5976_s30, 1  ;;  %s5976_s30 = sphi %s6029_s30, %s19_s30  }
   0x2   : > { %p287_p1 = scmp.lt.s32.totalorder %s5976_s30, 3 }
   0x4   : > { %p288_p2 = pnand %p4650_p0, %p287_p1 }
   0x5   : > { %v366_v0 = vld [vmem:[%s6994_s1] sm:$0x3] (!%p288_p2)  ;;  %vm503_vm0 = vcmask (!%p288_p2), 1041408   ;;  %p323_p3 = scmp.lt.s32.totalorder (!%p288_p2), %s4646_s10, 1  ;;  %vm882_vm1 = vcmask (!%p288_p2), 1043456   ;;  %vm454_vm2 = vcmask (!%p288_p2), 31744  }
   0x6   : > { %291 = sbr.rel (%p288_p2) target bundleno = 1545 (0x609), region = 56  ;;  %5905 = vmatprep.subr.msk.bf16.mxu0 (!%p288_p2), %vm503_vm0, %v366_v0  ;;  %v505_v1 = vsel (!%p288_p2), %vm503_vm0, %v366_v0, 0  ;;  %5906 = vmatprep.subr.msk.bf16.mxu1 (!%p288_p2), %vm503_vm0, %v366_v0  ;;  %v4688_v2 = vld [vmem:[%s6996_s3 + $0x4] sm:$0xf] (!%p288_p2)  ;;  %vm700_vm3 = vcmask (!%p288_p2), 64512   ;;  %v5978_v18 = vmov (!%p288_p2), 0.0  }
   0x7   : > { %5154 = vmatpush3.bf16.msra.mxu0 (!%p288_p2), %v505_v1  ;;  %5584 = vmatpush3.bf16.msra.mxu1 (!%p288_p2), %v505_v1  ;;  %v884_v10 = vsel (!%p288_p2), %vm882_vm1, %v4688_v2, 0  ;;  %711 = vst.msk [vmem:[#allocation2 + $0x48] sm:$0xff] (!%p288_p2), %vm700_vm3, %v5978_v18  ;;  %701 = vst.msk [vmem:[#allocation2] sm:$0xff] (!%p288_p2), %vm700_vm3, %v5978_v18  ;;  %vm704_vm4 = vcmask (!%p288_p2), 57344   ;;  %v831_v24 = vld [vmem:[%s6996_s3] sm:$0xf] (!%p288_p2) }
   0x8   : > { %5907 = vmatprep.subr.msk.bf16.mxu1 (!%p288_p2), %vm882_vm1, %v4688_v2  ;;  %702 = vst.msk [vmem:[#allocation2 + $0x8] sm:$0xff] (!%p288_p2), %vm700_vm3, %v5978_v18  ;;  %703 = vst.msk [vmem:[#allocation2 + $0x10] sm:$0xff] (!%p288_p2), %vm700_vm3, %v5978_v18  ;;  %v6240_v25 = vld [vmem:[%s6995_s2] ss:$0 sm:$0xff] (!%p288_p2)  ;;  %v1008_v55 = vsel (!%p288_p2), %vm882_vm1, %v831_v24, 0  ;;  %vm2685_vm5 = vcmask (!%p288_p2), 130048  }
   0x9   : > { %706 = vst.msk [vmem:[#allocation2 + $0x20] sm:$0xff] (!%p288_p2), %vm700_vm3, %v5978_v18  ;;  %707 = vst.msk [vmem:[#allocation2 + $0x28] sm:$0xff] (!%p288_p2), %vm700_vm3, %v5978_v18  ;;  %v4705_v60 = vld [vmem:[%s6996_s3 + $0x8] sm:$0xf] (!%p288_p2) }
   0xa   : > { %708 = vst.msk [vmem:[#allocation2 + $0x30] sm:$0xff] (!%p288_p2), %vm700_vm3, %v5978_v18  ;;  %710 = vst.msk [vmem:[#allocation2 + $0x40] sm:$0xff] (!%p288_p2), %vm700_vm3, %v5978_v18 }
   0xb   : > { %712 = vst.msk [vmem:[#allocation2 + $0x50] sm:$0xff] (!%p288_p2), %vm700_vm3, %v5978_v18  ;;  %714 = vst.msk [vmem:[#allocation2 + $0x60] sm:$0xff] (!%p288_p2), %vm700_vm3, %v5978_v18 }
   0xc   : > { %715 = vst.msk [vmem:[#allocation2 + $0x68] sm:$0xff] (!%p288_p2), %vm700_vm3, %v5978_v18  ;;  %716 = vst.msk [vmem:[#allocation2 + $0x70] sm:$0xff] (!%p288_p2), %vm700_vm3, %v5978_v18 }
   0xd   : > { %s7004_s10 = smov (!%p323_p3, %s4646_s10), 1  ;;  %718 = vst.msk [vmem:[#allocation2 + $0x80] sm:$0xff] %vm700_vm3, %v5978_v18  ;;  %719 = vst.msk [vmem:[#allocation2 + $0x88] sm:$0xff] %vm700_vm3, %v5978_v18 }
   0xe   : > { %s4936_s15 = sshll.u32 %s7004_s10, 7  ;;  %720 = vst.msk [vmem:[#allocation2 + $0x90] sm:$0xff] %vm700_vm3, %v5978_v18  ;;  %722 = vst.msk [vmem:[#allocation2 + $0xa0] sm:$0xff] %vm700_vm3, %v5978_v18  ;;  %s4937_s29 = sshll.u32 %s7004_s10, 8 }
   0xf   : > { %s6053_s18 = scalar_lea.vmem %s6993_s0, %s4936_s15  ;;  %723 = vst.msk [vmem:[#allocation2 + $0xa8] sm:$0xff] %vm700_vm3, %v5978_v18  ;;  %724 = vst.msk [vmem:[#allocation2 + $0xb0] sm:$0xff] %vm700_vm3, %v5978_v18  ;;  %v832_v21 = vld [vmem:[#allocation2 + $0x8] sm:$0xff]  ;;  %v833_v22 = vld [vmem:[#allocation2 + $0x10] sm:$0xff]  ;;  %s6775_s13 = scalar_lea.vmem %s7002_s9, %s4937_s29 }
  0x10   : > { %v5938_v3 = vld [vmem:[%s6053_s18] sm:$0xff]   ;;  %v5939_v4 = vld [vmem:[%s6053_s18 + $0x8] sm:$0xff]   ;;  %v5940_v5 = vld [vmem:[%s6053_s18 + $0x10] sm:$0xff]   ;;  %726 = vst.msk [vmem:[#allocation2 + $0xc0] sm:$0xff] %vm700_vm3, %v5978_v18  ;;  %v848_v23 = vpack.c.bf16 %v833_v22, %v832_v21 }
  0x11   : > { %5155 = vmatprep.mubr.msk.bf16.mxu0 %vm454_vm2, %v5938_v3  ;;  %v5941_v6 = vld [vmem:[%s6053_s18 + $0x18] sm:$0xff]   ;;  %v5942_v7 = vld [vmem:[%s6053_s18 + $0x20] sm:$0xff]   ;;  %v5947_v9 = vld [vmem:[%s6053_s18 + $0x48] sm:$0xff]   ;;  %727 = vst.msk [vmem:[#allocation2 + $0xc8] sm:$0xff] %vm700_vm3, %v5978_v18 }
  0x12   : > { %5156 = vmatmul.mubr.msk.bf16.vlgmr.msra.gmra.mrb[0].mxu0 %vm454_vm2, %v5939_v4  ;;  %v5946_v8 = vld [vmem:[%s6053_s18 + $0x40] sm:$0xff]   ;;  %v5948_v11 = vld [vmem:[%s6053_s18 + $0x50] sm:$0xff]   ;;  %v5943_v12 = vld [vmem:[%s6053_s18 + $0x28] sm:$0xff]   ;;  %728 = vst.msk [vmem:[#allocation2 + $0xd0] sm:$0xff] %vm700_vm3, %v5978_v18 }
  0x13   : > { %5159 = vmatprep.mubr.msk.bf16.mxu0 %vm454_vm2, %v5940_v5  ;;  %5171 = vmatprep.mubr.msk.bf16.mxu1 %vm454_vm2, %v5946_v8  ;;  %v5949_v13 = vld [vmem:[%s6053_s18 + $0x58] sm:$0xff]   ;;  %v5944_v14 = vld [vmem:[%s6053_s18 + $0x30] sm:$0xff]   ;;  %v5950_v15 = vld [vmem:[%s6053_s18 + $0x60] sm:$0xff]   ;;  %730 = vst.msk [vmem:[#allocation2 + $0xe0] sm:$0xff] %vm700_vm3, %v5978_v18 }
  0x14   : > { %5172 = vmatmul.mubr.msk.bf16.vlgmr.msra.gmra.mrb[0].mxu1 %vm454_vm2, %v5947_v9  ;;  %v5945_v16 = vld [vmem:[%s6053_s18 + $0x38] sm:$0xff]   ;;  %v5951_v17 = vld [vmem:[%s6053_s18 + $0x68] sm:$0xff]   ;;  %731 = vst.msk [vmem:[#allocation2 + $0xe8] sm:$0xff] %vm700_vm3, %v5978_v18  ;;  %732 = vst.msk [vmem:[#allocation2 + $0xf0] sm:$0xff] %vm700_vm3, %v5978_v18 }
  0x15   : > { %5188 = vmatpush3.bf16.msra.mxu1 %v884_v10  ;;  %5175 = vmatprep.mubr.msk.bf16.mxu1 %vm454_vm2, %v5948_v11  ;;  %734 = vst.msk [vmem:[#allocation2 + $0x100] sm:$0xff] %vm700_vm3, %v5978_v18  ;;  %735 = vst.msk [vmem:[#allocation2 + $0x108] sm:$0xff] %vm700_vm3, %v5978_v18  ;;  %v5952_v19 = vld [vmem:[%s6053_s18 + $0x70] sm:$0xff]   ;;  %v5953_v20 = vld [vmem:[%s6053_s18 + $0x78] sm:$0xff]  }
  0x16   : > { %736 = vst.msk [vmem:[#allocation2 + $0x110] sm:$0xff] %vm700_vm3, %v5978_v18  ;;  %738 = vst.msk [vmem:[#allocation2 + $0x120] sm:$0xff] %vm700_vm3, %v5978_v18  ;;  %5908 = vmatprep.subr.msk.bf16.mxu1 %vm882_vm1, %v831_v24 }
  0x17   : > { %739 = vst.msk [vmem:[#allocation2 + $0x128] sm:$0xff] %vm700_vm3, %v5978_v18  ;;  %740 = vst.msk [vmem:[#allocation2 + $0x130] sm:$0xff] %vm700_vm3, %v5978_v18 }
  0x18   : > { %742 = vst.msk [vmem:[#allocation2 + $0x140] sm:$0xff] %vm700_vm3, %v5978_v18  ;;  %743 = vst.msk [vmem:[#allocation2 + $0x148] sm:$0xff] %vm700_vm3, %v5978_v18 }
  0x19   : > { %744 = vst.msk [vmem:[#allocation2 + $0x150] sm:$0xff] %vm700_vm3, %v5978_v18  ;;  %746 = vst.msk [vmem:[#allocation2 + $0x160] sm:$0xff] %vm700_vm3, %v5978_v18 }
  0x1a   : > { %5160 = vmatmul.mubr.msk.bf16.gmra.mrb[4].mxu0 %vm454_vm2, %v5941_v6  ;;  %747 = vst.msk [vmem:[#allocation2 + $0x168] sm:$0xff] %vm700_vm3, %v5978_v18  ;;  %748 = vst.msk [vmem:[#allocation2 + $0x170] sm:$0xff] %vm700_vm3, %v5978_v18 }
  0x1b   : > { %5163 = vmatprep.mubr.msk.bf16.mxu0 %vm454_vm2, %v5942_v7  ;;  %750 = vst.msk [vmem:[#allocation2 + $0x180] sm:$0xff] %vm700_vm3, %v5978_v18  ;;  %751 = vst.msk [vmem:[#allocation2 + $0x188] sm:$0xff] %vm700_vm3, %v5978_v18 }
  0x1c   : > { %5176 = vmatmul.mubr.msk.bf16.gmra.mrb[4].mxu1 %vm454_vm2, %v5949_v13  ;;  %752 = vst.msk [vmem:[#allocation2 + $0x190] sm:$0xff] %vm700_vm3, %v5978_v18  ;;  %754 = vst.msk [vmem:[#allocation2 + $0x1a0] sm:$0xff] %vm700_vm3, %v5978_v18 }
  0x1d   : > { %5179 = vmatprep.mubr.msk.bf16.mxu1 %vm454_vm2, %v5950_v15  ;;  %755 = vst.msk [vmem:[#allocation2 + $0x1a8] sm:$0xff] %vm700_vm3, %v5978_v18  ;;  %756 = vst.msk [vmem:[#allocation2 + $0x1b0] sm:$0xff] %vm700_vm3, %v5978_v18 }
  0x1e   : > { %758 = vst.msk [vmem:[#allocation2 + $0x1c0] sm:$0xff] %vm700_vm3, %v5978_v18  ;;  %759 = vst.msk [vmem:[#allocation2 + $0x1c8] sm:$0xff] %vm700_vm3, %v5978_v18 }
  0x1f   : > { %760 = vst.msk [vmem:[#allocation2 + $0x1d0] sm:$0xff] %vm700_vm3, %v5978_v18  ;;  %762 = vst.msk [vmem:[#allocation2 + $0x1e0] sm:$0xff] %vm700_vm3, %v5978_v18 }
  0x20   : > { %763 = vst.msk [vmem:[#allocation2 + $0x1e8] sm:$0xff] %vm700_vm3, %v5978_v18  ;;  %764 = vst.msk [vmem:[#allocation2 + $0x1f0] sm:$0xff] %vm700_vm3, %v5978_v18 }
  0x21   : > { %766 = vst.msk [vmem:[#allocation2 + $0x200] sm:$0xff] %vm700_vm3, %v5978_v18  ;;  %767 = vst.msk [vmem:[#allocation2 + $0x208] sm:$0xff] %vm700_vm3, %v5978_v18 }
  0x22   : > { %5164 = vmatmul.mubr.msk.bf16.gmra.mrb[8].mxu0 %vm454_vm2, %v5943_v12  ;;  %768 = vst.msk [vmem:[#allocation2 + $0x210] sm:$0xff] %vm700_vm3, %v5978_v18  ;;  %770 = vst.msk [vmem:[#allocation2 + $0x220] sm:$0xff] %vm700_vm3, %v5978_v18 }
  0x23   : > { %5167 = vmatprep.mubr.msk.bf16.mxu0 %vm454_vm2, %v5944_v14  ;;  %771 = vst.msk [vmem:[#allocation2 + $0x228] sm:$0xff] %vm700_vm3, %v5978_v18  ;;  %772 = vst.msk [vmem:[#allocation2 + $0x230] sm:$0xff] %vm700_vm3, %v5978_v18 }
  0x24   : > { %5180 = vmatmul.mubr.msk.bf16.gmra.mrb[8].mxu1 %vm454_vm2, %v5951_v17  ;;  %705 = vst.msk [vmem:[#allocation2 + $0x18] sm:$0x1] %vm704_vm4, %v5978_v18  ;;  %709 = vst.msk [vmem:[#allocation2 + $0x38] sm:$0x1] %vm704_vm4, %v5978_v18 }
  0x25   : > { %5183 = vmatprep.mubr.msk.bf16.mxu1 %vm454_vm2, %v5952_v19  ;;  %713 = vst.msk [vmem:[#allocation2 + $0x58] sm:$0x1] %vm704_vm4, %v5978_v18  ;;  %717 = vst.msk [vmem:[#allocation2 + $0x78] sm:$0x1] %vm704_vm4, %v5978_v18 }
  0x26   : > { %721 = vst.msk [vmem:[#allocation2 + $0x98] sm:$0x1] %vm704_vm4, %v5978_v18  ;;  %725 = vst.msk [vmem:[#allocation2 + $0xb8] sm:$0x1] %vm704_vm4, %v5978_v18 }
  0x27   : > { %729 = vst.msk [vmem:[#allocation2 + $0xd8] sm:$0x1] %vm704_vm4, %v5978_v18  ;;  %733 = vst.msk [vmem:[#allocation2 + $0xf8] sm:$0x1] %vm704_vm4, %v5978_v18 }
  0x28   : > { %737 = vst.msk [vmem:[#allocation2 + $0x118] sm:$0x1] %vm704_vm4, %v5978_v18  ;;  %741 = vst.msk [vmem:[#allocation2 + $0x138] sm:$0x1] %vm704_vm4, %v5978_v18 }
  0x29   : > { %745 = vst.msk [vmem:[#allocation2 + $0x158] sm:$0x1] %vm704_vm4, %v5978_v18  ;;  %749 = vst.msk [vmem:[#allocation2 + $0x178] sm:$0x1] %vm704_vm4, %v5978_v18 }
  0x2a   : > { %5168 = vmatmul.mubr.msk.bf16.gmra.mrb[12].mxu0 %vm454_vm2, %v5945_v16  ;;  %753 = vst.msk [vmem:[#allocation2 + $0x198] sm:$0x1] %vm704_vm4, %v5978_v18  ;;  %757 = vst.msk [vmem:[#allocation2 + $0x1b8] sm:$0x1] %vm704_vm4, %v5978_v18 }
  0x2b   : > { %761 = vst.msk [vmem:[#allocation2 + $0x1d8] sm:$0x1] %vm704_vm4, %v5978_v18  ;;  %765 = vst.msk [vmem:[#allocation2 + $0x1f8] sm:$0x1] %vm704_vm4, %v5978_v18 }
  0x2c   : > { %5184 = vmatmul.mubr.msk.bf16.gmra.mrb[12].mxu1 %vm454_vm2, %v5953_v20  ;;  %769 = vst.msk [vmem:[#allocation2 + $0x218] sm:$0x1] %vm704_vm4, %v5978_v18  ;;  %773 = vst.msk [vmem:[#allocation2 + $0x238] sm:$0x1] %vm704_vm4, %v5978_v18 }
  0x2d   : > { %5189 = vmatprep.mubr.msk.bf16.mxu1 %vm700_vm3, %v848_v23 }
  0xe5   : > { %v5157_v26 = vpop.f32.mrb[0].mxu0 }
  0xe6   : > { %v550_v27 = vadd.f32 %v5157_v26, %v6240_v25  ;;  %v541_v28 = vpop.f32.mrb[1].mxu0 }
  0xe7   : > { %v542_v29 = vadd.f32 %v6240_v25, %v541_v28  ;;  %v5158_v30 = vpop.f32.mrb[2].mxu0 }
  0xe8   : > { %v670_v31 = vmax.f32 %v550_v27, 0.0  ;;  %v553_v32 = vadd.f32 %v5158_v30, %v6240_v25  ;;  %v544_v33 = vpop.f32.mrb[3].mxu0 }
  0xe9   : > { %v668_v34 = vmax.f32 %v542_v29, 0.0  ;;  %v545_v35 = vadd.f32 %v6240_v25, %v544_v33 }
  0xea   : > { %777 = vst.msk [vmem:[#allocation2 + $0x48] sm:$0xff] %vm700_vm3, %v670_v31  ;;  %v671_v36 = vmax.f32 %v553_v32, 0.0  ;;  %v807_v31 = vld [vmem:[#allocation2 + $0x7] sm:$0xff]  ;;  %v808_v32 = vld [vmem:[#allocation2 + $0xf] sm:$0xff] }
  0xeb   : > { %775 = vst.msk [vmem:[#allocation2 + $0x28] sm:$0xff] %vm700_vm3, %v668_v34  ;;  %v669_v37 = vmax.f32 %v545_v35, 0.0  ;;  %v823_v35 = vpack.c.bf16 %v808_v32, %v807_v31 }
  0xec   : > { %778 = vst.msk [vmem:[#allocation2 + $0x50] sm:$0xff] %vm700_vm3, %v671_v36 }
  0xed   : > { %776 = vst.msk [vmem:[#allocation2 + $0x30] sm:$0xff] %vm700_vm3, %v669_v37  ;;  %v5161_v38 = vpop.f32.mrb[4].mxu0 }
  0xee   : > { %v566_v39 = vadd.f32 %v5161_v38, %v6240_v25  ;;  %v557_v40 = vpop.f32.mrb[5].mxu0 }
  0xef   : > { %v558_v41 = vadd.f32 %v6240_v25, %v557_v40  ;;  %v5162_v42 = vpop.f32.mrb[6].mxu0 }
  0xf0   : > { %v674_v43 = vmax.f32 %v566_v39, 0.0  ;;  %v569_v44 = vadd.f32 %v5162_v42, %v6240_v25  ;;  %v560_v45 = vpop.f32.mrb[7].mxu0 }
  0xf1   : > { %v672_v46 = vmax.f32 %v558_v41, 0.0  ;;  %v561_v47 = vadd.f32 %v6240_v25, %v560_v45  ;;  %v836_v56 = vld [vmem:[#allocation2 + $0x48] sm:$0xff]  ;;  %v1158_v41 = vsel %vm882_vm1, %v4705_v60, 0 }
  0xf2   : > { %781 = vst.msk [vmem:[#allocation2 + $0x88] sm:$0xff] %vm700_vm3, %v674_v43  ;;  %v675_v48 = vmax.f32 %v569_v44, 0.0  ;;  %v834_v51 = vld [vmem:[#allocation2 + $0x28] sm:$0xff] }
  0xf3   : > { %779 = vst.msk [vmem:[#allocation2 + $0x68] sm:$0xff] %vm700_vm3, %v672_v46  ;;  %v673_v49 = vmax.f32 %v561_v47, 0.0  ;;  %v837_v50 = vld [vmem:[#allocation2 + $0x50] sm:$0xff]  ;;  %v809_v39 = vld [vmem:[#allocation2 + $0x27] sm:$0xff] }
  0xf4   : > { %782 = vst.msk [vmem:[#allocation2 + $0x90] sm:$0xff] %vm700_vm3, %v675_v48  ;;  %v835_v52 = vld [vmem:[#allocation2 + $0x30] sm:$0xff]  ;;  %v6262_v59 = vpack.c.bf16 %v837_v50, %v836_v56  ;;  %v811_v42 = vld [vmem:[#allocation2 + $0x47] sm:$0xff] }
  0xf5   : > { %780 = vst.msk [vmem:[#allocation2 + $0x70] sm:$0xff] %vm700_vm3, %v673_v49  ;;  %v5165_v53 = vpop.f32.mrb[8].mxu0  ;;  %v6258_v54 = vpack.c.bf16 %v835_v52, %v834_v51  ;;  %v810_v37 = vld [vmem:[#allocation2 + $0x2f] sm:$0xff]  ;;  %v5173_v51 = vpop.f32.mrb[0].mxu1 }
  0xf6   : > { %v582_v57 = vadd.f32 %v5165_v53, %v6240_v25  ;;  %v573_v58 = vpop.f32.mrb[9].mxu0  ;;  %v812_v38 = vld [vmem:[#allocation2 + $0x4f] sm:$0xff]  ;;  %v6308_v40 = vpack.c.bf16 %v810_v37, %v809_v39  ;;  %v614_v52 = vadd.f32 %v5173_v51, %v6240_v25 }
  0xf7   : > { %v574_v61 = vadd.f32 %v6240_v25, %v573_v58  ;;  %v5166_v62 = vpop.f32.mrb[10].mxu0  ;;  %5190 = vmatmul.mubr.msk.bf16.vlgmr.msra.gmra.mrb[16].mxu1 %vm700_vm3, %v6258_v54  ;;  %v6311_v43 = vpack.c.bf16 %v812_v38, %v811_v42  ;;  %v6316_v44 = vld [vmem:[%s6996_s3 + $0xc] sm:$0xf]  ;;  %v1112_v32 = vld [vmem:[#allocation2 + $0x51] sm:$0xff] }
  0xf8   : > { %v678_v63 = vmax.f32 %v582_v57, 0.0  ;;  %v585_v0 = vadd.f32 %v5166_v62, %v6240_v25  ;;  %5206 = vmatpush3.bf16.msra.mxu1 %v1008_v55  ;;  %v576_v1 = vpop.f32.mrb[11].mxu0  ;;  %5193 = vmatprep.mubr.msk.bf16.mxu1 %vm700_vm3, %v6262_v59  ;;  %v686_v56 = vmax.f32 %v614_v52, 0.0  ;;  %v605_v62 = vpop.f32.mrb[1].mxu1  ;;  %v1111_v31 = vld [vmem:[#allocation2 + $0x49] sm:$0xff]  ;;  %v1324_v38 = vsel %vm882_vm1, %v6316_v44, 0 }
  0xf9   : > { %v676_v2 = vmax.f32 %v574_v61, 0.0  ;;  %v577_v3 = vadd.f32 %v6240_v25, %v576_v1  ;;  %5909 = vmatprep.subr.msk.bf16.mxu1 %vm882_vm1, %v4705_v60  ;;  %v840_v11 = vld [vmem:[#allocation2 + $0x88] sm:$0xff]  ;;  %v4723_v42 = vld [vmem:[%s6996_s3 + $0x10] sm:$0xf] }
  0xfa   : > { %785 = vst.msk [vmem:[#allocation2 + $0xc8] sm:$0xff] %vm700_vm3, %v678_v63  ;;  %v679_v4 = vmax.f32 %v585_v0, 0.0  ;;  %v838_v7 = vld [vmem:[#allocation2 + $0x68] sm:$0xff]  ;;  %793 = vst.msk [vmem:[#allocation2 + $0x148] sm:$0xff] %vm700_vm3, %v686_v56  ;;  %v606_v63 = vadd.f32 %v6240_v25, %v605_v62  ;;  %v5174_v0 = vpop.f32.mrb[2].mxu1 }
  0xfb   : > { %783 = vst.msk [vmem:[#allocation2 + $0xa8] sm:$0xff] %vm700_vm3, %v676_v2  ;;  %v677_v5 = vmax.f32 %v577_v3, 0.0  ;;  %v841_v6 = vld [vmem:[#allocation2 + $0x90] sm:$0xff]  ;;  %v813_v47 = vld [vmem:[#allocation2 + $0x67] sm:$0xff]  ;;  %v617_v3 = vadd.f32 %v5174_v0, %v6240_v25 }
  0xfc   : > { %786 = vst.msk [vmem:[#allocation2 + $0xd0] sm:$0xff] %vm700_vm3, %v679_v4  ;;  %v839_v8 = vld [vmem:[#allocation2 + $0x70] sm:$0xff]  ;;  %v6282_v14 = vpack.c.bf16 %v841_v6, %v840_v11  ;;  %v815_v49 = vld [vmem:[#allocation2 + $0x87] sm:$0xff]  ;;  %v608_v4 = vpop.f32.mrb[3].mxu1  ;;  %v684_v6 = vmax.f32 %v606_v63, 0.0 }
  0xfd   : > { %784 = vst.msk [vmem:[#allocation2 + $0xb0] sm:$0xff] %vm700_vm3, %v677_v5  ;;  %v5169_v9 = vpop.f32.mrb[12].mxu0  ;;  %v6279_v10 = vpack.c.bf16 %v839_v8, %v838_v7  ;;  %v814_v45 = vld [vmem:[#allocation2 + $0x6f] sm:$0xff]  ;;  %v609_v7 = vadd.f32 %v6240_v25, %v608_v4  ;;  %v5177_v8 = vpop.f32.mrb[4].mxu1 }
  0xfe   : > { %v598_v12 = vadd.f32 %v5169_v9, %v6240_v25  ;;  %v589_v13 = vpop.f32.mrb[13].mxu0  ;;  %v816_v46 = vld [vmem:[#allocation2 + $0x8f] sm:$0xff]  ;;  %v6324_v48 = vpack.c.bf16 %v814_v45, %v813_v47  ;;  %v687_v9 = vmax.f32 %v617_v3, 0.0  ;;  %v630_v11 = vadd.f32 %v5177_v8, %v6240_v25  ;;  %791 = vst.msk [vmem:[#allocation2 + $0x128] sm:$0xff] %vm700_vm3, %v684_v6 }
  0xff   : > { %v590_v15 = vadd.f32 %v6240_v25, %v589_v13  ;;  %v5170_v16 = vpop.f32.mrb[14].mxu0  ;;  %5194 = vmatmul.mubr.msk.bf16.gmra.mrb[20].mxu1 %vm700_vm3, %v6279_v10  ;;  %v6326_v50 = vpack.c.bf16 %v816_v46, %v815_v49  ;;  %v1107_v1 = vld [vmem:[#allocation2 + $0x9] sm:$0xff]  ;;  %v1108_v2 = vld [vmem:[#allocation2 + $0x11] sm:$0xff] }
 0x100   : > { %v682_v17 = vmax.f32 %v598_v12, 0.0  ;;  %v601_v18 = vadd.f32 %v5170_v16, %v6240_v25  ;;  %v592_v19 = vpop.f32.mrb[15].mxu0  ;;  %5197 = vmatprep.mubr.msk.bf16.mxu1 %vm700_vm3, %v6282_v14  ;;  %v1123_v13 = vpack.c.bf16 %v1108_v2, %v1107_v1  ;;  %794 = vst.msk [vmem:[#allocation2 + $0x150] sm:$0xff] %vm700_vm3, %v687_v9  ;;  %v1113_v47 = vld [vmem:[#allocation2 + $0x69] sm:$0xff]  ;;  %v1114_v49 = vld [vmem:[#allocation2 + $0x71] sm:$0xff] }
 0x101   : > { %v680_v20 = vmax.f32 %v590_v15, 0.0  ;;  %v593_v21 = vadd.f32 %v6240_v25, %v592_v19  ;;  %v844_v29 = vld [vmem:[#allocation2 + $0xc8] sm:$0xff]  ;;  %v685_v15 = vmax.f32 %v609_v7, 0.0  ;;  %v6380_v62 = vpack.c.bf16 %v1114_v49, %v1113_v47  ;;  %v4759_v47 = vld [vmem:[%s6996_s3 + $0x20] sm:$0xf] }
 0x102   : > { %789 = vst.msk [vmem:[#allocation2 + $0x108] sm:$0xff] %vm700_vm3, %v682_v17  ;;  %v683_v22 = vmax.f32 %v601_v18, 0.0  ;;  %v842_v26 = vld [vmem:[#allocation2 + $0xa8] sm:$0xff]  ;;  %v690_v17 = vmax.f32 %v630_v11, 0.0  ;;  %v621_v18 = vpop.f32.mrb[5].mxu1 }
 0x103   : > { %787 = vst.msk [vmem:[#allocation2 + $0xe8] sm:$0xff] %vm700_vm3, %v680_v20  ;;  %v681_v23 = vmax.f32 %v593_v21, 0.0  ;;  %v845_v24 = vld [vmem:[#allocation2 + $0xd0] sm:$0xff]  ;;  %v817_v57 = vld [vmem:[#allocation2 + $0xa7] sm:$0xff]  ;;  %792 = vst.msk [vmem:[#allocation2 + $0x130] sm:$0xff] %vm700_vm3, %v685_v15  ;;  %v622_v19 = vadd.f32 %v6240_v25, %v621_v18  ;;  %v5178_v20 = vpop.f32.mrb[6].mxu1 }
 0x104   : > { %790 = vst.msk [vmem:[#allocation2 + $0x110] sm:$0xff] %vm700_vm3, %v683_v22  ;;  %v843_v27 = vld [vmem:[#allocation2 + $0xb0] sm:$0xff]  ;;  %v6297_v30 = vpack.c.bf16 %v845_v24, %v844_v29  ;;  %v819_v60 = vld [vmem:[#allocation2 + $0xc7] sm:$0xff]  ;;  %797 = vst.msk [vmem:[#allocation2 + $0x188] sm:$0xff] %vm700_vm3, %v690_v17  ;;  %v633_v21 = vadd.f32 %v5178_v20, %v6240_v25  ;;  %v624_v22 = vpop.f32.mrb[7].mxu1 }
 0x105   : > { %788 = vst.msk [vmem:[#allocation2 + $0xf0] sm:$0xff] %vm700_vm3, %v681_v23  ;;  %v6295_v28 = vpack.c.bf16 %v843_v27, %v842_v26  ;;  %v818_v53 = vld [vmem:[#allocation2 + $0xaf] sm:$0xff]  ;;  %v688_v26 = vmax.f32 %v622_v19, 0.0  ;;  %v625_v27 = vadd.f32 %v6240_v25, %v624_v22  ;;  %v5181_v29 = vpop.f32.mrb[8].mxu1 }
 0x106   : > { %v820_v55 = vld [vmem:[#allocation2 + $0xcf] sm:$0xff]  ;;  %v6333_v58 = vpack.c.bf16 %v818_v53, %v817_v57 }
 0x107   : > { %5198 = vmatmul.mubr.msk.bf16.gmra.mrb[24].mxu1 %vm700_vm3, %v6295_v28  ;;  %v6336_v61 = vpack.c.bf16 %v820_v55, %v819_v60  ;;  %v1109_v23 = vld [vmem:[#allocation2 + $0x29] sm:$0xff]  ;;  %v1110_v24 = vld [vmem:[#allocation2 + $0x31] sm:$0xff]  ;;  %795 = vst.msk [vmem:[#allocation2 + $0x168] sm:$0xff] %vm700_vm3, %v688_v26 }
 0x108   : > { %5201 = vmatprep.mubr.msk.bf16.mxu1 %vm700_vm3, %v6297_v30  ;;  %v6360_v37 = vpack.c.bf16 %v1110_v24, %v1109_v23  ;;  %v1115_v53 = vld [vmem:[#allocation2 + $0x89] sm:$0xff]  ;;  %v1116_v55 = vld [vmem:[#allocation2 + $0x91] sm:$0xff]  ;;  %v1490_v24 = vsel %vm882_vm1, %v4723_v42, 0 }
 0x109   : > { %v6383_v0 = vpack.c.bf16 %v1116_v55, %v1115_v53  ;;  %v1117_v6 = vld [vmem:[#allocation2 + $0xa9] sm:$0xff]  ;;  %v1118_v7 = vld [vmem:[#allocation2 + $0xb1] sm:$0xff] }
 0x10a   : > { %v846_v33 = vld [vmem:[#allocation2 + $0xe8] sm:$0xff]  ;;  %v6396_v19 = vpack.c.bf16 %v1118_v7, %v1117_v6  ;;  %v4732_v26 = vld [vmem:[%s6996_s3 + $0x14] sm:$0xf] }
 0x10b   : > { %v821_v12 = vld [vmem:[#allocation2 + $0xe7] sm:$0xff] }
 0x10c   : > { %v847_v34 = vld [vmem:[#allocation2 + $0xf0] sm:$0xff] }
 0x10d   : > { %v6303_v36 = vpack.c.bf16 %v847_v34, %v846_v33  ;;  %v822_v5 = vld [vmem:[#allocation2 + $0xef] sm:$0xff]  ;;  %v691_v33 = vmax.f32 %v633_v21, 0.0  ;;  %v646_v34 = vadd.f32 %v5181_v29, %v6240_v25 }
 0x10e   : > { %v6347_v16 = vpack.c.bf16 %v822_v5, %v821_v12  ;;  %v1119_v12 = vld [vmem:[#allocation2 + $0xc9] sm:$0xff]  ;;  %v1122_v22 = vld [vmem:[#allocation2 + $0xf1] sm:$0xff] }
 0x10f   : > { %5202 = vmatmul.mubr.msk.bf16.gmra.mrb[28].mxu1 %vm700_vm3, %v6303_v36  ;;  %798 = vst.msk [vmem:[#allocation2 + $0x190] sm:$0xff] %vm700_vm3, %v691_v33  ;;  %v694_v39 = vmax.f32 %v646_v34, 0.0  ;;  %v1453_v33 = vld [vmem:[#allocation2 + $0x108] sm:$0xff] }
 0x110   : > { %5207 = vmatprep.mubr.msk.bf16.mxu1 %vm700_vm3, %v823_v35  ;;  %v689_v35 = vmax.f32 %v625_v27, 0.0  ;;  %v1287_v27 = vld [vmem:[#allocation2 + $0x107] sm:$0xff] }
 0x111   : > { %801 = vst.msk [vmem:[#allocation2 + $0x1c8] sm:$0xff] %vm700_vm3, %v694_v39 }
 0x112   : > { %796 = vst.msk [vmem:[#allocation2 + $0x170] sm:$0xff] %vm700_vm3, %v689_v35  ;;  %v2317_v35 = vld [vmem:[%s6998_s5] sm:$0xf] }
 0x113   : > { %5916 = vmatprep.subr.msk.bf16.mxu0 %vm882_vm1, %v2317_v35 }
 0x117   : > { %5208 = vmatmul.mubr.msk.bf16.vlgmr.msra.gmra.mrb[16].mxu1 %vm700_vm3, %v6308_v40 }
 0x118   : > { %5224 = vmatpush3.bf16.msra.mxu1 %v1158_v41  ;;  %5211 = vmatprep.mubr.msk.bf16.mxu1 %vm700_vm3, %v6311_v43  ;;  %v6365_v41 = vpack.c.bf16 %v1112_v32, %v1111_v31  ;;  %v1656_v31 = vsel %vm882_vm1, %v4732_v26, 0  ;;  %v4741_v32 = vld [vmem:[%s6996_s3 + $0x18] sm:$0xf] }
 0x119   : > { %5910 = vmatprep.subr.msk.bf16.mxu1 %vm882_vm1, %v6316_v44  ;;  %v637_v44 = vpop.f32.mrb[9].mxu1  ;;  %v1823_v39 = vsel %vm882_vm1, %v4741_v32, 0 }
 0x11a   : > { %v638_v45 = vadd.f32 %v6240_v25, %v637_v44  ;;  %v5182_v46 = vpop.f32.mrb[10].mxu1  ;;  %v1620_v44 = vld [vmem:[#allocation2 + $0x111] sm:$0xff] }
 0x11b   : > { %v649_v51 = vadd.f32 %v5182_v46, %v6240_v25  ;;  %v640_v52 = vpop.f32.mrb[11].mxu1 }
 0x11c   : > { %v692_v56 = vmax.f32 %v638_v45, 0.0  ;;  %v641_v57 = vadd.f32 %v6240_v25, %v640_v52  ;;  %v5185_v1 = vpop.f32.mrb[12].mxu1 }
 0x11d   : > { %v695_v60 = vmax.f32 %v649_v51, 0.0  ;;  %v662_v2 = vadd.f32 %v5185_v1, %v6240_v25  ;;  %v653_v3 = vpop.f32.mrb[13].mxu1 }
 0x11e   : > { %799 = vst.msk [vmem:[#allocation2 + $0x1a8] sm:$0xff] %vm700_vm3, %v692_v56  ;;  %v693_v63 = vmax.f32 %v641_v57, 0.0  ;;  %v654_v4 = vadd.f32 %v6240_v25, %v653_v3  ;;  %v5186_v5 = vpop.f32.mrb[14].mxu1 }
 0x11f   : > { %5212 = vmatmul.mubr.msk.bf16.gmra.mrb[20].mxu1 %vm700_vm3, %v6324_v48  ;;  %802 = vst.msk [vmem:[#allocation2 + $0x1d0] sm:$0xff] %vm700_vm3, %v695_v60  ;;  %v698_v8 = vmax.f32 %v662_v2, 0.0  ;;  %v665_v9 = vadd.f32 %v5186_v5, %v6240_v25  ;;  %v656_v11 = vpop.f32.mrb[15].mxu1 }
 0x120   : > { %5215 = vmatprep.mubr.msk.bf16.mxu1 %vm700_vm3, %v6326_v50  ;;  %800 = vst.msk [vmem:[#allocation2 + $0x1b0] sm:$0xff] %vm700_vm3, %v693_v63  ;;  %v696_v15 = vmax.f32 %v654_v4, 0.0  ;;  %v657_v17 = vadd.f32 %v6240_v25, %v656_v11  ;;  %v1121_v25 = vld [vmem:[#allocation2 + $0xe9] sm:$0xff] }
 0x121   : > { %805 = vst.msk [vmem:[#allocation2 + $0x208] sm:$0xff] %vm700_vm3, %v698_v8  ;;  %v699_v18 = vmax.f32 %v665_v9, 0.0  ;;  %v6407_v23 = vpack.c.bf16 %v1122_v22, %v1121_v25  ;;  %v4795_v9 = vld [vmem:[%s6996_s3 + $0x4] sm:$0xf] }
 0x122   : > { %803 = vst.msk [vmem:[#allocation2 + $0x1e8] sm:$0xff] %vm700_vm3, %v696_v15  ;;  %v697_v20 = vmax.f32 %v657_v17, 0.0 }
 0x123   : > { %806 = vst.msk [vmem:[#allocation2 + $0x210] sm:$0xff] %vm700_vm3, %v699_v18 }
 0x124   : > { %804 = vst.msk [vmem:[#allocation2 + $0x1f0] sm:$0xff] %vm700_vm3, %v697_v20 }
 0x127   : > { %5216 = vmatmul.mubr.msk.bf16.gmra.mrb[24].mxu1 %vm700_vm3, %v6333_v58 }
 0x128   : > { %5219 = vmatprep.mubr.msk.bf16.mxu1 %vm700_vm3, %v6336_v61 }
 0x12f   : > { %5220 = vmatmul.mubr.msk.bf16.gmra.mrb[28].mxu1 %vm700_vm3, %v6347_v16 }
 0x130   : > { %5225 = vmatprep.mubr.msk.bf16.mxu1 %vm700_vm3, %v1123_v13  ;;  %v1120_v13 = vld [vmem:[#allocation2 + $0xd1] sm:$0xff] }
 0x131   : > { %v6399_v21 = vpack.c.bf16 %v1120_v13, %v1119_v12 }
 0x137   : > { %5226 = vmatmul.mubr.msk.bf16.vlgmr.msra.gmra.mrb[16].mxu1 %vm700_vm3, %v6360_v37 }
 0x138   : > { %5242 = vmatpush3.bf16.msra.mxu1 %v1324_v38  ;;  %5229 = vmatprep.mubr.msk.bf16.mxu1 %vm700_vm3, %v6365_v41  ;;  %v2350_v38 = vsel %vm882_vm1, %v2317_v35, 0 }
 0x139   : > { %5911 = vmatprep.subr.msk.bf16.mxu1 %vm882_vm1, %v4723_v42  ;;  %5350 = vmatpush3.bf16.msra.mxu0 %v2350_v38  ;;  %v4750_v42 = vld [vmem:[%s6996_s3 + $0x1c] sm:$0xf] }
 0x13a   : > { %v1989_v46 = vsel %vm882_vm1, %v4750_v42, 0 }
 0x13f   : > { %5230 = vmatmul.mubr.msk.bf16.gmra.mrb[20].mxu1 %vm700_vm3, %v6380_v62 }
 0x140   : > { %5233 = vmatprep.mubr.msk.bf16.mxu1 %vm700_vm3, %v6383_v0 }
 0x147   : > { %5234 = vmatmul.mubr.msk.bf16.gmra.mrb[24].mxu1 %vm700_vm3, %v6396_v19 }
 0x148   : > { %5237 = vmatprep.mubr.msk.bf16.mxu1 %vm700_vm3, %v6399_v21 }
 0x14f   : > { %5238 = vmatmul.mubr.msk.bf16.gmra.mrb[28].mxu1 %vm700_vm3, %v6407_v23 }
 0x150   : > { %5243 = vmatprep.mubr.msk.bf16.mxu1 %vm700_vm3, %v6308_v40  ;;  %v1288_v40 = vld [vmem:[#allocation2 + $0x10f] sm:$0xff] }
 0x151   : > { %v6430_v29 = vpack.c.bf16 %v1288_v40, %v1287_v27 }
 0x157   : > { %5244 = vmatmul.mubr.msk.bf16.vlgmr.msra.gmra.mrb[16].mxu1 %vm700_vm3, %v6311_v43 }
 0x158   : > { %5260 = vmatpush3.bf16.msra.mxu1 %v1490_v24  ;;  %5247 = vmatprep.mubr.msk.bf16.mxu1 %vm700_vm3, %v6324_v48 }
 0x159   : > { %5912 = vmatprep.subr.msk.bf16.mxu1 %vm882_vm1, %v4732_v26 }
 0x15f   : > { %5248 = vmatmul.mubr.msk.bf16.gmra.mrb[20].mxu1 %vm700_vm3, %v6326_v50 }
 0x160   : > { %5251 = vmatprep.mubr.msk.bf16.mxu1 %vm700_vm3, %v6333_v58 }
 0x167   : > { %5252 = vmatmul.mubr.msk.bf16.gmra.mrb[24].mxu1 %vm700_vm3, %v6336_v61 }
 0x168   : > { %5255 = vmatprep.mubr.msk.bf16.mxu1 %vm700_vm3, %v6347_v16 }
 0x16f   : > { %5256 = vmatmul.mubr.msk.bf16.gmra.mrb[28].mxu1 %vm700_vm3, %v6430_v29 }
 0x170   : > { %5261 = vmatprep.mubr.msk.bf16.mxu1 %vm700_vm3, %v6258_v54  ;;  %v1454_v54 = vld [vmem:[#allocation2 + $0x110] sm:$0xff] }
 0x171   : > { %v6453_v34 = vpack.c.bf16 %v1454_v54, %v1453_v33 }
 0x177   : > { %5262 = vmatmul.mubr.msk.bf16.vlgmr.msra.gmra.mrb[16].mxu1 %vm700_vm3, %v6262_v59 }
 0x178   : > { %5278 = vmatpush3.bf16.msra.mxu1 %v1656_v31  ;;  %5265 = vmatprep.mubr.msk.bf16.mxu1 %vm700_vm3, %v6279_v10 }
 0x179   : > { %5913 = vmatprep.subr.msk.bf16.mxu1 %vm882_vm1, %v4741_v32 }
 0x17f   : > { %5266 = vmatmul.mubr.msk.bf16.gmra.mrb[20].mxu1 %vm700_vm3, %v6282_v14 }
 0x180   : > { %5269 = vmatprep.mubr.msk.bf16.mxu1 %vm700_vm3, %v6295_v28 }
 0x187   : > { %5270 = vmatmul.mubr.msk.bf16.gmra.mrb[24].mxu1 %vm700_vm3, %v6297_v30 }
 0x188   : > { %5273 = vmatprep.mubr.msk.bf16.mxu1 %vm700_vm3, %v6303_v36 }
 0x18f   : > { %5274 = vmatmul.mubr.msk.bf16.gmra.mrb[28].mxu1 %vm700_vm3, %v6453_v34 }
 0x190   : > { %5279 = vmatprep.mubr.msk.bf16.mxu1 %vm700_vm3, %v6360_v37  ;;  %v1619_v37 = vld [vmem:[#allocation2 + $0x109] sm:$0xff] }
 0x191   : > { %v6481_v45 = vpack.c.bf16 %v1620_v44, %v1619_v37 }
 0x197   : > { %5280 = vmatmul.mubr.msk.bf16.vlgmr.msra.gmra.mrb[16].mxu1 %vm700_vm3, %v6365_v41 }
 0x198   : > { %5296 = vmatpush3.bf16.msra.mxu1 %v1823_v39  ;;  %5283 = vmatprep.mubr.msk.bf16.mxu1 %vm700_vm3, %v6380_v62 }
 0x199   : > { %5914 = vmatprep.subr.msk.bf16.mxu1 %vm882_vm1, %v4750_v42 }
 0x19f   : > { %5284 = vmatmul.mubr.msk.bf16.gmra.mrb[20].mxu1 %vm700_vm3, %v6383_v0 }
 0x1a0   : > { %5287 = vmatprep.mubr.msk.bf16.mxu1 %vm700_vm3, %v6396_v19 }
 0x1a7   : > { %5288 = vmatmul.mubr.msk.bf16.gmra.mrb[24].mxu1 %vm700_vm3, %v6399_v21 }
 0x1a8   : > { %5291 = vmatprep.mubr.msk.bf16.mxu1 %vm700_vm3, %v6407_v23 }
 0x1af   : > { %5292 = vmatmul.mubr.msk.bf16.gmra.mrb[28].mxu1 %vm700_vm3, %v6481_v45 }
 0x1b0   : > { %5297 = vmatprep.mubr.msk.bf16.mxu1 %vm700_vm3, %v6311_v43  ;;  %v1786_v43 = vld [vmem:[#allocation2 + $0x127] sm:$0xff] }
 0x1b7   : > { %5298 = vmatmul.mubr.msk.bf16.vlgmr.msra.gmra.mrb[16].mxu1 %vm700_vm3, %v6324_v48  ;;  %v1787_v48 = vld [vmem:[#allocation2 + $0x12f] sm:$0xff] }
 0x1b8   : > { %5314 = vmatpush3.bf16.msra.mxu1 %v1989_v46  ;;  %5301 = vmatprep.mubr.msk.bf16.mxu1 %vm700_vm3, %v6326_v50  ;;  %v6504_v49 = vpack.c.bf16 %v1787_v48, %v1786_v43  ;;  %v2155_v50 = vsel %vm882_vm1, %v4759_v47, 0 }
 0x1b9   : > { %5915 = vmatprep.subr.msk.bf16.mxu1 %vm882_vm1, %v4759_v47 }
 0x1bf   : > { %5302 = vmatmul.mubr.msk.bf16.gmra.mrb[20].mxu1 %vm700_vm3, %v6333_v58  ;;  %v1953_v58 = vld [vmem:[#allocation2 + $0x130] sm:$0xff] }
 0x1c0   : > { %5305 = vmatprep.mubr.msk.bf16.mxu1 %vm700_vm3, %v6336_v61 }
 0x1c7   : > { %5306 = vmatmul.mubr.msk.bf16.gmra.mrb[24].mxu1 %vm700_vm3, %v6347_v16 }
 0x1c8   : > { %5309 = vmatprep.mubr.msk.bf16.mxu1 %vm700_vm3, %v6430_v29 }
 0x1cf   : > { %5310 = vmatmul.mubr.msk.bf16.gmra.mrb[28].mxu1 %vm700_vm3, %v6504_v49 }
 0x1d0   : > { %5315 = vmatprep.mubr.msk.bf16.mxu1 %vm700_vm3, %v6262_v59  ;;  %v1952_v59 = vld [vmem:[#allocation2 + $0x128] sm:$0xff] }
 0x1d1   : > { %v6523_v61 = vpack.c.bf16 %v1953_v58, %v1952_v59 }
 0x1d7   : > { %5316 = vmatmul.mubr.msk.bf16.vlgmr.msra.gmra.mrb[16].mxu1 %vm700_vm3, %v6279_v10  ;;  %v2118_v10 = vld [vmem:[#allocation2 + $0x129] sm:$0xff] }
 0x1d8   : > { %5332 = vmatpush3.bf16.msra.mxu1 %v2155_v50  ;;  %5319 = vmatprep.mubr.msk.bf16.mxu1 %vm700_vm3, %v6282_v14  ;;  %v2119_v14 = vld [vmem:[#allocation2 + $0x131] sm:$0xff] }
 0x1df   : > { %5320 = vmatmul.mubr.msk.bf16.gmra.mrb[20].mxu1 %vm700_vm3, %v6295_v28  ;;  %v6541_v28 = vpack.c.bf16 %v2119_v14, %v2118_v10 }
 0x1e0   : > { %5323 = vmatprep.mubr.msk.bf16.mxu1 %vm700_vm3, %v6297_v30  ;;  %v2465_v30 = vld [vmem:[%s7000_s7] sm:$0x3] }
 0x1e1   : > { %5917 = vmatprep.subr.msk.bf16.mxu0 %vm503_vm0, %v2465_v30  ;;  %v2531_v6 = vsel %vm503_vm0, %v2465_v30, 0 }
 0x1e7   : > { %5324 = vmatmul.mubr.msk.bf16.gmra.mrb[24].mxu1 %vm700_vm3, %v6303_v36  ;;  %v4768_v36 = vld [vmem:[%s6997_s4] ss:$0 sm:$0xff] }
 0x1e8   : > { %5327 = vmatprep.mubr.msk.bf16.mxu1 %vm700_vm3, %v6453_v34 }
 0x1ef   : > { %5328 = vmatmul.mubr.msk.bf16.gmra.mrb[28].mxu1 %vm700_vm3, %v6523_v61 }
 0x1f0   : > { %5333 = vmatprep.mubr.msk.bf16.mxu1 %vm700_vm3, %v6365_v41 }
 0x1f7   : > { %5334 = vmatmul.mubr.msk.bf16.vlgmr.msra.gmra.mrb[16].mxu1 %vm700_vm3, %v6380_v62 }
 0x1f8   : > { %5337 = vmatprep.mubr.msk.bf16.mxu1 %vm700_vm3, %v6383_v0 }
 0x1ff   : > { %5338 = vmatmul.mubr.msk.bf16.gmra.mrb[20].mxu1 %vm700_vm3, %v6396_v19 }
 0x200   : > { %5341 = vmatprep.mubr.msk.bf16.mxu1 %vm700_vm3, %v6399_v21 }
 0x207   : > { %5342 = vmatmul.mubr.msk.bf16.gmra.mrb[24].mxu1 %vm700_vm3, %v6407_v23 }
 0x208   : > { %5345 = vmatprep.mubr.msk.bf16.mxu1 %vm700_vm3, %v6481_v45 }
 0x20f   : > { %5346 = vmatmul.mubr.msk.bf16.gmra.mrb[28].mxu1 %vm700_vm3, %v6541_v28 }
 0x2ca   : > { %v5335_v16 = vpop.f32.mrb[16].mxu1 }
 0x2cb   : > { %v2279_v41 = vadd.f32 %v5335_v16, %v4768_v36  ;;  %v2191_v51 = vpop.f32.mrb[17].mxu1 }
 0x2cc   : > { %v2277_v52 = vadd.f32 %v4768_v36, %v2191_v51  ;;  %v5336_v53 = vpop.f32.mrb[18].mxu1  ;;  %v5955_v51 = vld [vmem:[%s6053_s18 + $0x8] sm:$0xff]  }
 0x2cd   : > { %v2280_v55 = vadd.f32 %v5336_v53, %v4768_v36  ;;  %v2194_v56 = vpop.f32.mrb[19].mxu1  ;;  %v2295_v60 = vmax.f32 %v2279_v41, 0.0  ;;  %v5954_v41 = vld [vmem:[%s6053_s18] sm:$0xff]  }
 0x2ce   : > { %v2278_v57 = vadd.f32 %v4768_v36, %v2194_v56  ;;  %v2293_v63 = vmax.f32 %v2277_v52, 0.0  ;;  %v2778_v52 = vsel %vm882_vm1, %v4795_v9, 0  ;;  %v2727_v53 = vld [vmem:[%s6996_s3] sm:$0xf] }
 0x2cf   : > { %v2296_v62 = vmax.f32 %v2280_v55, 0.0  ;;  %v5957_v55 = vld [vmem:[%s6053_s18 + $0x18] sm:$0xff]   ;;  %v5958_v56 = vld [vmem:[%s6053_s18 + $0x20] sm:$0xff]  }
 0x2d0   : > { %v2294_v0 = vmax.f32 %v2278_v57, 0.0  ;;  %v5959_v57 = vld [vmem:[%s6053_s18 + $0x28] sm:$0xff]  }
 0x2d1   : > { %v2310_v1 = vpack.c.bf16 %v2296_v62, %v2295_v60  ;;  %v5960_v60 = vld [vmem:[%s6053_s18 + $0x30] sm:$0xff]   ;;  %v5961_v62 = vld [vmem:[%s6053_s18 + $0x38] sm:$0xff]  }
 0x2d2   : > { %v2309_v2 = vpack.c.bf16 %v2294_v0, %v2293_v63  ;;  %v5339_v3 = vpop.f32.mrb[20].mxu1  ;;  %v2732_v63 = vld [vmem:[#allocation2 + $0x148] sm:$0xff]  ;;  %v2733_v0 = vld [vmem:[#allocation2 + $0x150] sm:$0xff] }
 0x2d3   : > { %v2283_v4 = vadd.f32 %v5339_v3, %v4768_v36  ;;  %v2207_v5 = vpop.f32.mrb[21].mxu1  ;;  %v4812_v3 = vld [vmem:[%s6996_s3 + $0x8] sm:$0xf] }
 0x2d4   : > { %v2281_v7 = vadd.f32 %v4768_v36, %v2207_v5  ;;  %v5340_v8 = vpop.f32.mrb[22].mxu1  ;;  %5351 = vmatprep.mubr.msk.bf16.mxu0 %vm700_vm3, %v2309_v2  ;;  %v6589_v2 = vpack.c.bf16 %v2733_v0, %v2732_v63  ;;  %v2736_v5 = vld [vmem:[#allocation2 + $0x188] sm:$0xff]  ;;  %v4839_v63 = vld [vmem:[%s6996_s3 + $0x14] sm:$0xf] }
 0x2d5   : > { %v2284_v11 = vadd.f32 %v5340_v8, %v4768_v36  ;;  %v2210_v12 = vpop.f32.mrb[23].mxu1  ;;  %5352 = vmatmul.mubr.msk.bf16.vlgmr.msra.gmra.mrb[16].mxu0 %vm700_vm3, %v2310_v1  ;;  %v2299_v15 = vmax.f32 %v2283_v4, 0.0  ;;  %v2902_v1 = vsel %vm882_vm1, %v2727_v53, 0  ;;  %v2735_v4 = vld [vmem:[#allocation2 + $0x170] sm:$0xff] }
 0x2d6   : > { %v2282_v13 = vadd.f32 %v4768_v36, %v2210_v12  ;;  %5368 = vmatpush3.bf16.msra.mxu0 %v2531_v6  ;;  %v2297_v18 = vmax.f32 %v2281_v7, 0.0  ;;  %v2737_v6 = vld [vmem:[#allocation2 + $0x190] sm:$0xff]  ;;  %v2740_v12 = vld [vmem:[#allocation2 + $0x1c8] sm:$0xff] }
 0x2d7   : > { %v2300_v17 = vmax.f32 %v2284_v11, 0.0  ;;  %5918 = vmatprep.subr.msk.bf16.mxu0 %vm882_vm1, %v4795_v9  ;;  %v6601_v8 = vpack.c.bf16 %v2737_v6, %v2736_v5  ;;  %v2738_v9 = vld [vmem:[#allocation2 + $0x1a8] sm:$0xff]  ;;  %v2739_v11 = vld [vmem:[#allocation2 + $0x1b0] sm:$0xff]  ;;  %v4205_v6 = vld [vmem:[%s6998_s5] sm:$0xf] }
 0x2d8   : > { %v2298_v19 = vmax.f32 %v2282_v13, 0.0  ;;  %v2741_v13 = vld [vmem:[#allocation2 + $0x1d0] sm:$0xff]  ;;  %5927 = vmatprep.subr.msk.bf16.mxu1 %vm882_vm1, %v4205_v6 }
 0x2d9   : > { %v2312_v20 = vpack.c.bf16 %v2300_v17, %v2299_v15  ;;  %v6607_v15 = vpack.c.bf16 %v2739_v11, %v2738_v9  ;;  %v6609_v17 = vpack.c.bf16 %v2741_v13, %v2740_v12  ;;  %v3182_v0 = vld [vmem:[#allocation2 + $0x20f] sm:$0xff]  ;;  %v4238_v9 = vsel %vm882_vm1, %v4205_v6, 0  ;;  %v4857_v12 = vld [vmem:[%s6996_s3 + $0x1c] sm:$0xf] }
 0x2da   : > { %v2311_v21 = vpack.c.bf16 %v2298_v19, %v2297_v18  ;;  %v5343_v25 = vpop.f32.mrb[24].mxu1  ;;  %v2742_v18 = vld [vmem:[#allocation2 + $0x1e8] sm:$0xff]  ;;  %v2743_v19 = vld [vmem:[#allocation2 + $0x1f0] sm:$0xff]  ;;  %5548 = vmatpush3.bf16.msra.mxu1 %v4238_v9 }
 0x2db   : > { %v2287_v22 = vadd.f32 %v5343_v25, %v4768_v36  ;;  %v2223_v23 = vpop.f32.mrb[25].mxu1  ;;  %v2708_v25 = vld [vmem:[#allocation2 + $0x14f] sm:$0xff] }
 0x2dc   : > { %v2285_v24 = vadd.f32 %v4768_v36, %v2223_v23  ;;  %v5344_v26 = vpop.f32.mrb[26].mxu1  ;;  %5355 = vmatprep.mubr.msk.bf16.mxu0 %vm700_vm3, %v2311_v21  ;;  %v2707_v21 = vld [vmem:[#allocation2 + $0x147] sm:$0xff] }
 0x2dd   : > { %v2288_v40 = vadd.f32 %v5344_v26, %v4768_v36  ;;  %v2226_v27 = vpop.f32.mrb[27].mxu1  ;;  %5356 = vmatmul.mubr.msk.bf16.gmra.mrb[20].mxu0 %vm700_vm3, %v2312_v20  ;;  %v2303_v32 = vmax.f32 %v2287_v22, 0.0  ;;  %v6615_v20 = vpack.c.bf16 %v2743_v19, %v2742_v18  ;;  %v3051_v22 = vsel %vm882_vm1, %v4812_v3, 0  ;;  %v2710_v26 = vld [vmem:[#allocation2 + $0x16f] sm:$0xff]  ;;  %v6763_v18 = vld [vmem:[%s7001_s8] ss:$0 sm:$0xff] }
 0x2de   : > { %v2286_v31 = vadd.f32 %v4768_v36, %v2226_v27  ;;  %v2301_v33 = vmax.f32 %v2285_v24, 0.0  ;;  %v6622_v23 = vpack.c.bf16 %v2708_v25, %v2707_v21  ;;  %v4821_v24 = vld [vmem:[%s6996_s3 + $0xc] sm:$0xf]  ;;  %v3512_v21 = vld [vmem:[#allocation2 + $0x211] sm:$0xff] }
 0x2df   : > { %v2304_v54 = vmax.f32 %v2288_v40, 0.0  ;;  %v2711_v40 = vld [vmem:[#allocation2 + $0x187] sm:$0xff]  ;;  %v2712_v27 = vld [vmem:[#allocation2 + $0x18f] sm:$0xff] }
 0x2e0   : > { %v2302_v35 = vmax.f32 %v2286_v31, 0.0  ;;  %v3511_v19 = vld [vmem:[#allocation2 + $0x209] sm:$0xff] }
 0x2e1   : > { %v2314_v38 = vpack.c.bf16 %v2304_v54, %v2303_v32  ;;  %v6634_v32 = vpack.c.bf16 %v2712_v27, %v2711_v40  ;;  %v2713_v54 = vld [vmem:[#allocation2 + $0x1a7] sm:$0xff] }
 0x2e2   : > { %v2313_v39 = vpack.c.bf16 %v2302_v35, %v2301_v33  ;;  %v5347_v42 = vpop.f32.mrb[28].mxu1  ;;  %v2714_v33 = vld [vmem:[#allocation2 + $0x1af] sm:$0xff]  ;;  %v2715_v35 = vld [vmem:[#allocation2 + $0x1c7] sm:$0xff] }
 0x2e3   : > { %v2291_v37 = vadd.f32 %v5347_v42, %v4768_v36  ;;  %v2239_v44 = vpop.f32.mrb[29].mxu1 }
 0x2e4   : > { %v2289_v46 = vadd.f32 %v4768_v36, %v2239_v44  ;;  %v5348_v47 = vpop.f32.mrb[30].mxu1  ;;  %5359 = vmatprep.mubr.msk.bf16.mxu0 %vm700_vm3, %v2313_v39  ;;  %v6640_v39 = vpack.c.bf16 %v2714_v33, %v2713_v54  ;;  %v2718_v44 = vld [vmem:[#allocation2 + $0x1ef] sm:$0xff]  ;;  %v6770_v54 = vpack.c.bf16 %v3512_v21, %v3511_v19 }
 0x2e5   : > { %v2292_v43 = vadd.f32 %v5348_v47, %v4768_v36  ;;  %v2242_v48 = vpop.f32.mrb[31].mxu1  ;;  %5360 = vmatmul.mubr.msk.bf16.gmra.mrb[24].mxu0 %vm700_vm3, %v2314_v38  ;;  %v2307_v59 = vmax.f32 %v2291_v37, 0.0  ;;  %v2716_v38 = vld [vmem:[#allocation2 + $0x1cf] sm:$0xff]  ;;  %v2717_v37 = vld [vmem:[#allocation2 + $0x1e7] sm:$0xff] }
 0x2e6   : > { %v2290_v50 = vadd.f32 %v4768_v36, %v2242_v48  ;;  %v2305_v10 = vmax.f32 %v2289_v46, 0.0  ;;  %v5956_v36 = vld [vmem:[%s6053_s18 + $0x10] sm:$0xff]   ;;  %v6642_v42 = vpack.c.bf16 %v2716_v38, %v2715_v35  ;;  %v6648_v46 = vpack.c.bf16 %v2718_v44, %v2717_v37 }
 0x2e7   : > { %v2308_v58 = vmax.f32 %v2292_v43, 0.0  ;;  %v3005_v47 = vld [vmem:[#allocation2 + $0x149] sm:$0xff]  ;;  %v3006_v43 = vld [vmem:[#allocation2 + $0x151] sm:$0xff]  ;;  %v3217_v48 = vsel %vm882_vm1, %v4821_v24, 0 }
 0x2e8   : > { %v2306_v14 = vmax.f32 %v2290_v50, 0.0  ;;  %v6655_v50 = vpack.c.bf16 %v3006_v43, %v3005_v47 }
 0x2e9   : > { %v2316_v30 = vpack.c.bf16 %v2308_v58, %v2307_v59  ;;  %v4830_v59 = vld [vmem:[%s6996_s3 + $0x10] sm:$0xf] }
 0x2ea   : > { %v2315_v16 = vpack.c.bf16 %v2306_v14, %v2305_v10  ;;  %v3008_v58 = vld [vmem:[#allocation2 + $0x171] sm:$0xff]  ;;  %v3009_v10 = vld [vmem:[#allocation2 + $0x189] sm:$0xff] }
 0x2eb   : > { %v3010_v14 = vld [vmem:[#allocation2 + $0x191] sm:$0xff] }
 0x2ec   : > { %5363 = vmatprep.mubr.msk.bf16.mxu0 %vm700_vm3, %v2315_v16  ;;  %v6667_v16 = vpack.c.bf16 %v3010_v14, %v3009_v10 }
 0x2ed   : > { %5364 = vmatmul.mubr.msk.bf16.gmra.mrb[28].mxu0 %vm700_vm3, %v2316_v30 }
 0x2ee   : > { %5369 = vmatprep.mubr.msk.bf16.mxu0 %vm454_vm2, %v5954_v41  ;;  %v3011_v41 = vld [vmem:[#allocation2 + $0x1a9] sm:$0xff] }
 0x2f5   : > { %5370 = vmatmul.mubr.msk.bf16.vlgmr.msra.gmra.mrb[16].mxu0 %vm454_vm2, %v5955_v51  ;;  %v3012_v51 = vld [vmem:[#allocation2 + $0x1b1] sm:$0xff] }
 0x2f6   : > { %5386 = vmatpush3.bf16.msra.mxu0 %v2778_v52  ;;  %5373 = vmatprep.mubr.msk.bf16.mxu0 %vm454_vm2, %v5956_v36  ;;  %v3013_v36 = vld [vmem:[#allocation2 + $0x1c9] sm:$0xff]  ;;  %v3014_v52 = vld [vmem:[#allocation2 + $0x1d1] sm:$0xff] }
 0x2f7   : > { %5919 = vmatprep.subr.msk.bf16.mxu0 %vm882_vm1, %v2727_v53  ;;  %v6673_v53 = vpack.c.bf16 %v3012_v51, %v3011_v41 }
 0x2fd   : > { %5374 = vmatmul.mubr.msk.bf16.gmra.mrb[20].mxu0 %vm454_vm2, %v5957_v55  ;;  %v6675_v55 = vpack.c.bf16 %v3014_v52, %v3013_v36  ;;  %v3878_v36 = vsel %vm882_vm1, %v4857_v12, 0 }
 0x2fe   : > { %5377 = vmatprep.mubr.msk.bf16.mxu0 %vm454_vm2, %v5958_v56  ;;  %v3015_v56 = vld [vmem:[#allocation2 + $0x1e9] sm:$0xff] }
 0x305   : > { %5378 = vmatmul.mubr.msk.bf16.gmra.mrb[24].mxu0 %vm454_vm2, %v5959_v57  ;;  %v3016_v57 = vld [vmem:[#allocation2 + $0x1f1] sm:$0xff] }
 0x306   : > { %5381 = vmatprep.mubr.msk.bf16.mxu0 %vm454_vm2, %v5960_v60  ;;  %v6681_v60 = vpack.c.bf16 %v3016_v57, %v3015_v56  ;;  %v6803_v57 = vld [vmem:[%s6996_s3 + $0x20] sm:$0xf] }
 0x30d   : > { %5382 = vmatmul.mubr.msk.bf16.gmra.mrb[28].mxu0 %vm454_vm2, %v5961_v62  ;;  %v3382_v62 = vsel %vm882_vm1, %v4830_v59, 0 }
 0x30e   : > { %5387 = vmatprep.mubr.msk.bf16.mxu0 %vm700_vm3, %v6453_v34  ;;  %v2734_v34 = vld [vmem:[#allocation2 + $0x168] sm:$0xff] }
 0x30f   : > { %v6599_v7 = vpack.c.bf16 %v2735_v4, %v2734_v34  ;;  %v4848_v34 = vld [vmem:[%s6996_s3 + $0x18] sm:$0xf]  ;;  %v3347_v4 = vld [vmem:[#allocation2 + $0x210] sm:$0xff] }
 0x310   : > { %v3713_v11 = vsel %vm882_vm1, %v4848_v34, 0 }
 0x315   : > { %5388 = vmatmul.mubr.msk.bf16.vlgmr.msra.gmra.mrb[32].mxu0 %vm700_vm3, %v6523_v61 }
 0x316   : > { %5404 = vmatpush3.bf16.msra.mxu0 %v2902_v1  ;;  %5391 = vmatprep.mubr.msk.bf16.mxu0 %vm700_vm3, %v6589_v2 }
 0x317   : > { %5920 = vmatprep.subr.msk.bf16.mxu0 %vm882_vm1, %v4812_v3  ;;  %v3547_v3 = vsel %vm882_vm1, %v4839_v63, 0 }
 0x31d   : > { %5392 = vmatmul.mubr.msk.bf16.gmra.mrb[36].mxu0 %vm700_vm3, %v6599_v7 }
 0x31e   : > { %5395 = vmatprep.mubr.msk.bf16.mxu0 %vm700_vm3, %v6601_v8 }
 0x325   : > { %5396 = vmatmul.mubr.msk.bf16.gmra.mrb[40].mxu0 %vm700_vm3, %v6607_v15 }
 0x326   : > { %5399 = vmatprep.mubr.msk.bf16.mxu0 %vm700_vm3, %v6609_v17 }
 0x32d   : > { %5400 = vmatmul.mubr.msk.bf16.gmra.mrb[44].mxu0 %vm700_vm3, %v6615_v20 }
 0x32e   : > { %5405 = vmatprep.mubr.msk.bf16.mxu0 %vm700_vm3, %v6430_v29  ;;  %v2709_v29 = vld [vmem:[#allocation2 + $0x167] sm:$0xff] }
 0x32f   : > { %v6632_v31 = vpack.c.bf16 %v2710_v26, %v2709_v29 }
 0x335   : > { %5406 = vmatmul.mubr.msk.bf16.vlgmr.msra.gmra.mrb[32].mxu0 %vm700_vm3, %v6504_v49 }
 0x336   : > { %5422 = vmatpush3.bf16.msra.mxu0 %v3051_v22  ;;  %5409 = vmatprep.mubr.msk.bf16.mxu0 %vm700_vm3, %v6622_v23 }
 0x337   : > { %5921 = vmatprep.subr.msk.bf16.mxu0 %vm882_vm1, %v4821_v24 }
 0x33d   : > { %5410 = vmatmul.mubr.msk.bf16.gmra.mrb[36].mxu0 %vm700_vm3, %v6632_v31 }
 0x33e   : > { %5413 = vmatprep.mubr.msk.bf16.mxu0 %vm700_vm3, %v6634_v32 }
 0x345   : > { %5414 = vmatmul.mubr.msk.bf16.gmra.mrb[40].mxu0 %vm700_vm3, %v6640_v39 }
 0x346   : > { %5417 = vmatprep.mubr.msk.bf16.mxu0 %vm700_vm3, %v6642_v42 }
 0x34d   : > { %5418 = vmatmul.mubr.msk.bf16.gmra.mrb[44].mxu0 %vm700_vm3, %v6648_v46 }
 0x34e   : > { %5423 = vmatprep.mubr.msk.bf16.mxu0 %vm700_vm3, %v6481_v45  ;;  %v3007_v45 = vld [vmem:[#allocation2 + $0x169] sm:$0xff] }
 0x34f   : > { %v6665_v30 = vpack.c.bf16 %v3008_v58, %v3007_v45 }
 0x355   : > { %5424 = vmatmul.mubr.msk.bf16.vlgmr.msra.gmra.mrb[32].mxu0 %vm700_vm3, %v6541_v28 }
 0x356   : > { %5440 = vmatpush3.bf16.msra.mxu0 %v3217_v48  ;;  %5427 = vmatprep.mubr.msk.bf16.mxu0 %vm700_vm3, %v6655_v50 }
 0x357   : > { %5922 = vmatprep.subr.msk.bf16.mxu0 %vm882_vm1, %v4830_v59 }
 0x35d   : > { %5428 = vmatmul.mubr.msk.bf16.gmra.mrb[36].mxu0 %vm700_vm3, %v6665_v30 }
 0x35e   : > { %5431 = vmatprep.mubr.msk.bf16.mxu0 %vm700_vm3, %v6667_v16 }
 0x365   : > { %5432 = vmatmul.mubr.msk.bf16.gmra.mrb[40].mxu0 %vm700_vm3, %v6673_v53 }
 0x366   : > { %5435 = vmatprep.mubr.msk.bf16.mxu0 %vm700_vm3, %v6675_v55 }
 0x36d   : > { %5436 = vmatmul.mubr.msk.bf16.gmra.mrb[44].mxu0 %vm700_vm3, %v6681_v60 }
 0x36e   : > { %5441 = vmatprep.mubr.msk.bf16.mxu0 %vm700_vm3, %v6504_v49  ;;  %v3181_v49 = vld [vmem:[#allocation2 + $0x207] sm:$0xff] }
 0x36f   : > { %v6704_v1 = vpack.c.bf16 %v3182_v0, %v3181_v49 }
 0x375   : > { %5442 = vmatmul.mubr.msk.bf16.vlgmr.msra.gmra.mrb[32].mxu0 %vm700_vm3, %v6622_v23 }
 0x376   : > { %5458 = vmatpush3.bf16.msra.mxu0 %v3382_v62  ;;  %5445 = vmatprep.mubr.msk.bf16.mxu0 %vm700_vm3, %v6632_v31 }
 0x377   : > { %5923 = vmatprep.subr.msk.bf16.mxu0 %vm882_vm1, %v4839_v63 }
 0x37d   : > { %5446 = vmatmul.mubr.msk.bf16.gmra.mrb[36].mxu0 %vm700_vm3, %v6634_v32 }
 0x37e   : > { %5449 = vmatprep.mubr.msk.bf16.mxu0 %vm700_vm3, %v6640_v39 }
 0x385   : > { %5450 = vmatmul.mubr.msk.bf16.gmra.mrb[40].mxu0 %vm700_vm3, %v6642_v42 }
 0x386   : > { %5453 = vmatprep.mubr.msk.bf16.mxu0 %vm700_vm3, %v6648_v46 }
 0x38d   : > { %5454 = vmatmul.mubr.msk.bf16.gmra.mrb[44].mxu0 %vm700_vm3, %v6704_v1 }
 0x38e   : > { %5459 = vmatprep.mubr.msk.bf16.mxu0 %vm700_vm3, %v6523_v61  ;;  %v3346_v61 = vld [vmem:[#allocation2 + $0x208] sm:$0xff] }
 0x38f   : > { %v6727_v5 = vpack.c.bf16 %v3347_v4, %v3346_v61 }
 0x395   : > { %5460 = vmatmul.mubr.msk.bf16.vlgmr.msra.gmra.mrb[32].mxu0 %vm700_vm3, %v6589_v2 }
 0x396   : > { %5476 = vmatpush3.bf16.msra.mxu0 %v3547_v3  ;;  %5463 = vmatprep.mubr.msk.bf16.mxu0 %vm700_vm3, %v6599_v7 }
 0x397   : > { %5924 = vmatprep.subr.msk.bf16.mxu0 %vm882_vm1, %v4848_v34 }
 0x39d   : > { %5464 = vmatmul.mubr.msk.bf16.gmra.mrb[36].mxu0 %vm700_vm3, %v6601_v8 }
 0x39e   : > { %5467 = vmatprep.mubr.msk.bf16.mxu0 %vm700_vm3, %v6607_v15 }
 0x3a5   : > { %5468 = vmatmul.mubr.msk.bf16.gmra.mrb[40].mxu0 %vm700_vm3, %v6609_v17 }
 0x3a6   : > { %5471 = vmatprep.mubr.msk.bf16.mxu0 %vm700_vm3, %v6615_v20 }
 0x3ad   : > { %5472 = vmatmul.mubr.msk.bf16.gmra.mrb[44].mxu0 %vm700_vm3, %v6727_v5 }
 0x3ae   : > { %5477 = vmatprep.mubr.msk.bf16.mxu0 %vm700_vm3, %v6541_v28  ;;  %v6758_v28 = vld [vmem:[%s6999_s6] ss:$0 sm:$0xff] }
 0x3b5   : > { %5478 = vmatmul.mubr.msk.bf16.vlgmr.msra.gmra.mrb[32].mxu0 %vm700_vm3, %v6655_v50 }
 0x3b6   : > { %5494 = vmatpush3.bf16.msra.mxu0 %v3713_v11  ;;  %5481 = vmatprep.mubr.msk.bf16.mxu0 %vm700_vm3, %v6665_v30 }
 0x3b7   : > { %5925 = vmatprep.subr.msk.bf16.mxu0 %vm882_vm1, %v4857_v12 }
 0x3bd   : > { %5482 = vmatmul.mubr.msk.bf16.gmra.mrb[36].mxu0 %vm700_vm3, %v6667_v16 }
 0x3be   : > { %5485 = vmatprep.mubr.msk.bf16.mxu0 %vm700_vm3, %v6673_v53 }
 0x3c5   : > { %5486 = vmatmul.mubr.msk.bf16.gmra.mrb[40].mxu0 %vm700_vm3, %v6675_v55 }
 0x3c6   : > { %5489 = vmatprep.mubr.msk.bf16.mxu0 %vm700_vm3, %v6681_v60 }
 0x3c8   : > { %v5371_v13 = vpop.f32.mrb[16].mxu0 }
 0x3c9   : > { %v5585_v25 = vadd.f32 %v5371_v13, %v6758_v28  ;;  %v2567_v22 = vpop.f32.mrb[17].mxu0 }
 0x3ca   : > { %v5586_v24 = vadd.f32 %v6758_v28, %v2567_v22  ;;  %v5372_v29 = vpop.f32.mrb[18].mxu0 }
 0x3cb   : > { %v2655_v26 = vadd.f32 %v5585_v25, %v6763_v18  ;;  %v5587_v40 = vadd.f32 %v5372_v29, %v6758_v28  ;;  %v2570_v27 = vpop.f32.mrb[19].mxu0 }
 0x3cc   : > { %v2653_v33 = vadd.f32 %v5586_v24, %v6763_v18  ;;  %v5588_v35 = vadd.f32 %v6758_v28, %v2570_v27 }
 0x3cd   : > { %v2671_v38 = vmax.f32 %v2655_v26, 0.0  ;;  %v2656_v37 = vadd.f32 %v5587_v40, %v6763_v18  ;;  %5490 = vmatmul.mubr.msk.bf16.gmra.mrb[44].mxu0 %vm700_vm3, %v6770_v54 }
 0x3ce   : > { %v2669_v44 = vmax.f32 %v2653_v33, 0.0  ;;  %v2654_v47 = vadd.f32 %v5588_v35, %v6763_v18  ;;  %5495 = vmatprep.mubr.msk.bf16.mxu0 %vm700_vm3, %v6622_v23 }
 0x3cf   : > { %2688 = vst.msk [vmem:[%s6775_s13 + $0x10] sm:$0xff] %vm2685_vm5, %v2671_v38  ;;  %v2672_v43 = vmax.f32 %v2656_v37, 0.0 }
 0x3d0   : > { %2686 = vst.msk [vmem:[%s6775_s13] sm:$0xff] %vm2685_vm5, %v2669_v44  ;;  %v2670_v48 = vmax.f32 %v2654_v47, 0.0  ;;  %v5375_v59 = vpop.f32.mrb[20].mxu0 }
 0x3d1   : > { %2689 = vst.msk [vmem:[%s6775_s13 + $0x18] sm:$0xff] %vm2685_vm5, %v2672_v43  ;;  %v5589_v45 = vadd.f32 %v5375_v59, %v6758_v28  ;;  %v2583_v58 = vpop.f32.mrb[21].mxu0 }
 0x3d2   : > { %2687 = vst.msk [vmem:[%s6775_s13 + $0x8] sm:$0xff] %vm2685_vm5, %v2670_v48  ;;  %v5590_v10 = vadd.f32 %v6758_v28, %v2583_v58  ;;  %v5376_v14 = vpop.f32.mrb[22].mxu0  ;;  %v3677_v58 = vld [vmem:[#allocation2 + $0x227] sm:$0xff] }
 0x3d3   : > { %v2659_v23 = vadd.f32 %v5589_v45, %v6763_v18  ;;  %v5591_v41 = vadd.f32 %v5376_v14, %v6758_v28  ;;  %v2586_v51 = vpop.f32.mrb[23].mxu0 }
 0x3d4   : > { %v2657_v52 = vadd.f32 %v5590_v10, %v6763_v18  ;;  %v5592_v56 = vadd.f32 %v6758_v28, %v2586_v51  ;;  %v3678_v10 = vld [vmem:[#allocation2 + $0x22f] sm:$0xff] }
 0x3d5   : > { %v2675_v62 = vmax.f32 %v2659_v23, 0.0  ;;  %v2660_v63 = vadd.f32 %v5591_v41, %v6763_v18  ;;  %5496 = vmatmul.mubr.msk.bf16.vlgmr.msra.gmra.mrb[32].mxu0 %vm700_vm3, %v6632_v31  ;;  %v3686_v41 = vpack.c.bf16 %v3678_v10, %v3677_v58 }
 0x3d6   : > { %v2673_v49 = vmax.f32 %v2657_v52, 0.0  ;;  %v2658_v0 = vadd.f32 %v5592_v56, %v6763_v18  ;;  %5512 = vmatpush3.bf16.msra.mxu0 %v3878_v36  ;;  %5499 = vmatprep.mubr.msk.bf16.mxu0 %vm700_vm3, %v6634_v32 }
 0x3d7   : > { %2692 = vst.msk [vmem:[%s6775_s13 + $0x30] sm:$0xff] %vm2685_vm5, %v2675_v62  ;;  %v2676_v3 = vmax.f32 %v2660_v63, 0.0  ;;  %5926 = vmatprep.subr.msk.bf16.mxu0 %vm882_vm1, %v6803_v57 }
 0x3d8   : > { %2690 = vst.msk [vmem:[%s6775_s13 + $0x20] sm:$0xff] %vm2685_vm5, %v2673_v49  ;;  %v2674_v34 = vmax.f32 %v2658_v0, 0.0  ;;  %v5379_v61 = vpop.f32.mrb[24].mxu0 }
 0x3d9   : > { %2693 = vst.msk [vmem:[%s6775_s13 + $0x38] sm:$0xff] %vm2685_vm5, %v2676_v3  ;;  %v5593_v31 = vadd.f32 %v5379_v61, %v6758_v28  ;;  %v2599_v4 = vpop.f32.mrb[25].mxu0 }
 0x3da   : > { %2691 = vst.msk [vmem:[%s6775_s13 + $0x28] sm:$0xff] %vm2685_vm5, %v2674_v34  ;;  %v5594_v32 = vadd.f32 %v6758_v28, %v2599_v4  ;;  %v5380_v6 = vpop.f32.mrb[26].mxu0 }
 0x3db   : > { %v2663_v9 = vadd.f32 %v5593_v31, %v6763_v18  ;;  %v5595_v11 = vadd.f32 %v5380_v6, %v6758_v28  ;;  %v2602_v12 = vpop.f32.mrb[27].mxu0 }
 0x3dc   : > { %v2661_v13 = vadd.f32 %v5594_v32, %v6763_v18  ;;  %v5596_v19 = vadd.f32 %v6758_v28, %v2602_v12 }
 0x3dd   : > { %v2679_v21 = vmax.f32 %v2663_v9, 0.0  ;;  %v2664_v25 = vadd.f32 %v5595_v11, %v6763_v18  ;;  %5500 = vmatmul.mubr.msk.bf16.gmra.mrb[36].mxu0 %vm700_vm3, %v6640_v39 }
 0x3de   : > { %v2677_v22 = vmax.f32 %v2661_v13, 0.0  ;;  %v2662_v24 = vadd.f32 %v5596_v19, %v6763_v18  ;;  %5503 = vmatprep.mubr.msk.bf16.mxu0 %vm700_vm3, %v6642_v42 }
 0x3df   : > { %2696 = vst.msk [vmem:[%s6775_s13 + $0x50] sm:$0xff] %vm2685_vm5, %v2679_v21  ;;  %v2680_v29 = vmax.f32 %v2664_v25, 0.0 }
 0x3e0   : > { %2694 = vst.msk [vmem:[%s6775_s13 + $0x40] sm:$0xff] %vm2685_vm5, %v2677_v22  ;;  %v2678_v26 = vmax.f32 %v2662_v24, 0.0  ;;  %v5383_v40 = vpop.f32.mrb[28].mxu0 }
 0x3e1   : > { %2697 = vst.msk [vmem:[%s6775_s13 + $0x58] sm:$0xff] %vm2685_vm5, %v2680_v29  ;;  %v5597_v27 = vadd.f32 %v5383_v40, %v6758_v28  ;;  %v2615_v33 = vpop.f32.mrb[29].mxu0 }
 0x3e2   : > { %2695 = vst.msk [vmem:[%s6775_s13 + $0x48] sm:$0xff] %vm2685_vm5, %v2678_v26  ;;  %v5598_v39 = vadd.f32 %v6758_v28, %v2615_v33  ;;  %v5384_v35 = vpop.f32.mrb[30].mxu0 }
 0x3e3   : > { %v2667_v42 = vadd.f32 %v5597_v27, %v6763_v18  ;;  %v5599_v38 = vadd.f32 %v5384_v35, %v6758_v28  ;;  %v2618_v37 = vpop.f32.mrb[31].mxu0 }
 0x3e4   : > { %v2665_v44 = vadd.f32 %v5598_v39, %v6763_v18  ;;  %v5600_v47 = vadd.f32 %v6758_v28, %v2618_v37 }
 0x3e5   : > { %v2683_v43 = vmax.f32 %v2667_v42, 0.0  ;;  %v2668_v48 = vadd.f32 %v5599_v38, %v6763_v18  ;;  %5504 = vmatmul.mubr.msk.bf16.gmra.mrb[40].mxu0 %vm700_vm3, %v6648_v46  ;;  %v4043_v46 = vsel %vm882_vm1, %v6803_v57, 0 }
 0x3e6   : > { %v2681_v59 = vmax.f32 %v2665_v44, 0.0  ;;  %v2666_v45 = vadd.f32 %v5600_v47, %v6763_v18  ;;  %5507 = vmatprep.mubr.msk.bf16.mxu0 %vm700_vm3, %v6704_v1  ;;  %v3843_v1 = vld [vmem:[#allocation2 + $0x230] sm:$0xff] }
 0x3e7   : > { %2700 = vst.msk [vmem:[%s6775_s13 + $0x70] sm:$0xff] %vm2685_vm5, %v2683_v43  ;;  %v2684_v14 = vmax.f32 %v2668_v48, 0.0 }
 0x3e8   : > { %2698 = vst.msk [vmem:[%s6775_s13 + $0x60] sm:$0xff] %vm2685_vm5, %v2681_v59  ;;  %v2682_v23 = vmax.f32 %v2666_v45, 0.0 }
 0x3e9   : > { %2701 = vst.msk [vmem:[%s6775_s13 + $0x78] sm:$0xff] %vm2685_vm5, %v2684_v14 }
 0x3ea   : > { %2699 = vst.msk [vmem:[%s6775_s13 + $0x68] sm:$0xff] %vm2685_vm5, %v2682_v23 }
 0x3ed   : > { %5508 = vmatmul.mubr.msk.bf16.gmra.mrb[44].mxu0 %vm700_vm3, %v3686_v41 }
 0x3ee   : > { %5513 = vmatprep.mubr.msk.bf16.mxu0 %vm700_vm3, %v6589_v2  ;;  %v3842_v2 = vld [vmem:[#allocation2 + $0x228] sm:$0xff] }
 0x3ef   : > { %v3851_v51 = vpack.c.bf16 %v3843_v1, %v3842_v2 }
 0x3f5   : > { %5514 = vmatmul.mubr.msk.bf16.vlgmr.msra.gmra.mrb[32].mxu0 %vm700_vm3, %v6599_v7  ;;  %v4007_v7 = vld [vmem:[#allocation2 + $0x229] sm:$0xff] }
 0x3f6   : > { %5530 = vmatpush3.bf16.msra.mxu0 %v4043_v46  ;;  %5517 = vmatprep.mubr.msk.bf16.mxu0 %vm700_vm3, %v6601_v8  ;;  %v4008_v8 = vld [vmem:[#allocation2 + $0x231] sm:$0xff] }
 0x3fd   : > { %5518 = vmatmul.mubr.msk.bf16.gmra.mrb[36].mxu0 %vm700_vm3, %v6607_v15  ;;  %v4016_v15 = vpack.c.bf16 %v4008_v8, %v4007_v7  ;;  %v5962_v7 = vld [vmem:[%s6053_s18 + $0x40] sm:$0xff]   ;;  %v5963_v8 = vld [vmem:[%s6053_s18 + $0x48] sm:$0xff]  }
 0x3fe   : > { %5521 = vmatprep.mubr.msk.bf16.mxu0 %vm700_vm3, %v6609_v17  ;;  %v4354_v17 = vld [vmem:[%s7000_s7] sm:$0x3] }
 0x3ff   : > { %5928 = vmatprep.subr.msk.bf16.mxu1 %vm503_vm0, %v4354_v17  ;;  %v4420_v34 = vsel %vm503_vm0, %v4354_v17, 0  ;;  %v5965_v17 = vld [vmem:[%s6053_s18 + $0x58] sm:$0xff]  }
 0x405   : > { %5522 = vmatmul.mubr.msk.bf16.gmra.mrb[40].mxu0 %vm700_vm3, %v6615_v20  ;;  %v4875_v20 = vld [vmem:[%s6997_s4] ss:$0 sm:$0xff] }
 0x406   : > { %5525 = vmatprep.mubr.msk.bf16.mxu0 %vm700_vm3, %v6727_v5 }
 0x40d   : > { %5526 = vmatmul.mubr.msk.bf16.gmra.mrb[44].mxu0 %vm700_vm3, %v3851_v51 }
 0x40e   : > { %5531 = vmatprep.mubr.msk.bf16.mxu0 %vm700_vm3, %v6655_v50 }
 0x415   : > { %5532 = vmatmul.mubr.msk.bf16.vlgmr.msra.gmra.mrb[32].mxu0 %vm700_vm3, %v6665_v30 }
 0x416   : > { %5535 = vmatprep.mubr.msk.bf16.mxu0 %vm700_vm3, %v6667_v16 }
 0x41d   : > { %5536 = vmatmul.mubr.msk.bf16.gmra.mrb[36].mxu0 %vm700_vm3, %v6673_v53 }
 0x41e   : > { %5539 = vmatprep.mubr.msk.bf16.mxu0 %vm700_vm3, %v6675_v55 }
 0x425   : > { %5540 = vmatmul.mubr.msk.bf16.gmra.mrb[40].mxu0 %vm700_vm3, %v6681_v60 }
 0x426   : > { %5543 = vmatprep.mubr.msk.bf16.mxu0 %vm700_vm3, %v6770_v54 }
 0x42d   : > { %5544 = vmatmul.mubr.msk.bf16.gmra.mrb[44].mxu0 %vm700_vm3, %v4016_v15  ;;  %v5964_v15 = vld [vmem:[%s6053_s18 + $0x50] sm:$0xff]  }
 0x4e8   : > { %v5533_v50 = vpop.f32.mrb[32].mxu0 }
 0x4e9   : > { %v4167_v30 = vadd.f32 %v5533_v50, %v4875_v20  ;;  %v4079_v16 = vpop.f32.mrb[33].mxu0  ;;  %v5967_v50 = vld [vmem:[%s6053_s18 + $0x68] sm:$0xff]  }
 0x4ea   : > { %v4165_v53 = vadd.f32 %v4875_v20, %v4079_v16  ;;  %v5534_v55 = vpop.f32.mrb[34].mxu0  ;;  %v5969_v16 = vld [vmem:[%s6053_s18 + $0x78] sm:$0xff]  }
 0x4eb   : > { %v4168_v60 = vadd.f32 %v5534_v55, %v4875_v20  ;;  %v4082_v5 = vpop.f32.mrb[35].mxu0  ;;  %v4183_v36 = vmax.f32 %v4167_v30, 0.0  ;;  %v5968_v30 = vld [vmem:[%s6053_s18 + $0x70] sm:$0xff]  }
 0x4ec   : > { %v4166_v54 = vadd.f32 %v4875_v20, %v4082_v5  ;;  %v4181_v56 = vmax.f32 %v4165_v53, 0.0 }
 0x4ed   : > { %v4184_v52 = vmax.f32 %v4168_v60, 0.0 }
 0x4ee   : > { %v4182_v57 = vmax.f32 %v4166_v54, 0.0 }
 0x4ef   : > { %v4198_v62 = vpack.c.bf16 %v4184_v52, %v4183_v36 }
 0x4f0   : > { %v4197_v63 = vpack.c.bf16 %v4182_v57, %v4181_v56  ;;  %v5537_v49 = vpop.f32.mrb[36].mxu0 }
 0x4f1   : > { %v4171_v0 = vadd.f32 %v5537_v49, %v4875_v20  ;;  %v4095_v3 = vpop.f32.mrb[37].mxu0 }
 0x4f2   : > { %v4169_v61 = vadd.f32 %v4875_v20, %v4095_v3  ;;  %v5538_v31 = vpop.f32.mrb[38].mxu0  ;;  %5549 = vmatprep.mubr.msk.bf16.mxu1 %vm700_vm3, %v4197_v63 }
 0x4f3   : > { %v4172_v4 = vadd.f32 %v5538_v31, %v4875_v20  ;;  %v4098_v32 = vpop.f32.mrb[39].mxu0  ;;  %5550 = vmatmul.mubr.msk.bf16.vlgmr.msra.gmra.mrb[32].mxu1 %vm700_vm3, %v4198_v62  ;;  %v4187_v9 = vmax.f32 %v4171_v0, 0.0 }
 0x4f4   : > { %v4170_v6 = vadd.f32 %v4875_v20, %v4098_v32  ;;  %5566 = vmatpush3.bf16.msra.mxu1 %v4420_v34  ;;  %v4185_v12 = vmax.f32 %v4169_v61, 0.0 }
 0x4f5   : > { %v4188_v11 = vmax.f32 %v4172_v4, 0.0 }
 0x4f6   : > { %v4186_v13 = vmax.f32 %v4170_v6, 0.0 }
 0x4f7   : > { %v4200_v19 = vpack.c.bf16 %v4188_v11, %v4187_v9 }
 0x4f8   : > { %v4199_v21 = vpack.c.bf16 %v4186_v13, %v4185_v12  ;;  %v5541_v25 = vpop.f32.mrb[40].mxu0 }
 0x4f9   : > { %v4175_v22 = vadd.f32 %v5541_v25, %v4875_v20  ;;  %v4111_v24 = vpop.f32.mrb[41].mxu0 }
 0x4fa   : > { %v4173_v29 = vadd.f32 %v4875_v20, %v4111_v24  ;;  %v5542_v26 = vpop.f32.mrb[42].mxu0  ;;  %5553 = vmatprep.mubr.msk.bf16.mxu1 %vm700_vm3, %v4199_v21 }
 0x4fb   : > { %v4176_v40 = vadd.f32 %v5542_v26, %v4875_v20  ;;  %v4114_v27 = vpop.f32.mrb[43].mxu0  ;;  %5554 = vmatmul.mubr.msk.bf16.gmra.mrb[36].mxu1 %vm700_vm3, %v4200_v19  ;;  %v4191_v39 = vmax.f32 %v4175_v22, 0.0 }
 0x4fc   : > { %v4174_v33 = vadd.f32 %v4875_v20, %v4114_v27  ;;  %v4189_v42 = vmax.f32 %v4173_v29, 0.0 }
 0x4fd   : > { %v4192_v35 = vmax.f32 %v4176_v40, 0.0 }
 0x4fe   : > { %v4190_v38 = vmax.f32 %v4174_v33, 0.0 }
 0x4ff   : > { %v4202_v37 = vpack.c.bf16 %v4192_v35, %v4191_v39 }
 0x500   : > { %v4201_v44 = vpack.c.bf16 %v4190_v38, %v4189_v42  ;;  %v5545_v47 = vpop.f32.mrb[44].mxu0 }
 0x501   : > { %v4179_v43 = vadd.f32 %v5545_v47, %v4875_v20  ;;  %v4127_v48 = vpop.f32.mrb[45].mxu0 }
 0x502   : > { %v4177_v59 = vadd.f32 %v4875_v20, %v4127_v48  ;;  %v5546_v45 = vpop.f32.mrb[46].mxu0  ;;  %5557 = vmatprep.mubr.msk.bf16.mxu1 %vm700_vm3, %v4201_v44 }
 0x503   : > { %v4180_v58 = vadd.f32 %v5546_v45, %v4875_v20  ;;  %v4130_v10 = vpop.f32.mrb[47].mxu0  ;;  %5558 = vmatmul.mubr.msk.bf16.gmra.mrb[40].mxu1 %vm700_vm3, %v4202_v37  ;;  %v4195_v23 = vmax.f32 %v4179_v43, 0.0 }
 0x504   : > { %v4178_v14 = vadd.f32 %v4875_v20, %v4130_v10  ;;  %v4193_v46 = vmax.f32 %v4177_v59, 0.0  ;;  %v5966_v20 = vld [vmem:[%s6053_s18 + $0x60] sm:$0xff]  }
 0x505   : > { %v4196_v41 = vmax.f32 %v4180_v58, 0.0 }
 0x506   : > { %v4194_v2 = vmax.f32 %v4178_v14, 0.0 }
 0x507   : > { %v4204_v1 = vpack.c.bf16 %v4196_v41, %v4195_v23 }
 0x508   : > { %v4203_v51 = vpack.c.bf16 %v4194_v2, %v4193_v46 }
 0x50a   : > { %5561 = vmatprep.mubr.msk.bf16.mxu1 %vm700_vm3, %v4203_v51 }
 0x50b   : > { %5562 = vmatmul.mubr.msk.bf16.gmra.mrb[44].mxu1 %vm700_vm3, %v4204_v1 }
 0x50c   : > { %5567 = vmatprep.mubr.msk.bf16.mxu1 %vm454_vm2, %v5962_v7 }
 0x513   : > { %5568 = vmatmul.mubr.msk.bf16.vlgmr.msra.gmra.mrb[32].mxu1 %vm454_vm2, %v5963_v8 }
 0x514   : > { %5571 = vmatprep.mubr.msk.bf16.mxu1 %vm454_vm2, %v5964_v15 }
 0x51b   : > { %5572 = vmatmul.mubr.msk.bf16.gmra.mrb[36].mxu1 %vm454_vm2, %v5965_v17 }
 0x51c   : > { %5575 = vmatprep.mubr.msk.bf16.mxu1 %vm454_vm2, %v5966_v20 }
 0x523   : > { %5576 = vmatmul.mubr.msk.bf16.gmra.mrb[40].mxu1 %vm454_vm2, %v5967_v50 }
 0x524   : > { %5579 = vmatprep.mubr.msk.bf16.mxu1 %vm454_vm2, %v5968_v30 }
 0x52b   : > { %5580 = vmatmul.mubr.msk.bf16.gmra.mrb[44].mxu1 %vm454_vm2, %v5969_v16 }
 0x5e6   : > { %v5569_v53 = vpop.f32.mrb[32].mxu1 }
 0x5e7   : > { %v5601_v55 = vadd.f32 %v5569_v53, %v6758_v28  ;;  %v4456_v60 = vpop.f32.mrb[33].mxu1 }
 0x5e8   : > { %v5602_v5 = vadd.f32 %v6758_v28, %v4456_v60  ;;  %v5570_v54 = vpop.f32.mrb[34].mxu1 }
 0x5e9   : > { %v4544_v36 = vadd.f32 %v5601_v55, %v6763_v18  ;;  %v5603_v52 = vadd.f32 %v5570_v54, %v6758_v28  ;;  %v4459_v56 = vpop.f32.mrb[35].mxu1 }
 0x5ea   : > { %v4542_v57 = vadd.f32 %v5602_v5, %v6763_v18  ;;  %v5604_v62 = vadd.f32 %v6758_v28, %v4459_v56 }
 0x5eb   : > { %v4560_v63 = vmax.f32 %v4544_v36, 0.0  ;;  %v4545_v49 = vadd.f32 %v5603_v52, %v6763_v18 }
 0x5ec   : > { %v4558_v0 = vmax.f32 %v4542_v57, 0.0  ;;  %v4543_v3 = vadd.f32 %v5604_v62, %v6763_v18 }
 0x5ed   : > { %4920 = vst.msk [vmem:[%s6775_s13 + $0x90] sm:$0xff] %vm2685_vm5, %v4560_v63  ;;  %v4561_v34 = vmax.f32 %v4545_v49, 0.0 }
 0x5ee   : > { %4918 = vst.msk [vmem:[%s6775_s13 + $0x80] sm:$0xff] %vm2685_vm5, %v4558_v0  ;;  %v4559_v61 = vmax.f32 %v4543_v3, 0.0  ;;  %v5573_v31 = vpop.f32.mrb[36].mxu1 }
 0x5ef   : > { %4921 = vst.msk [vmem:[%s6775_s13 + $0x98] sm:$0xff] %vm2685_vm5, %v4561_v34  ;;  %v5605_v4 = vadd.f32 %v5573_v31, %v6758_v28  ;;  %v4472_v32 = vpop.f32.mrb[37].mxu1 }
 0x5f0   : > { %4919 = vst.msk [vmem:[%s6775_s13 + $0x88] sm:$0xff] %vm2685_vm5, %v4559_v61  ;;  %v5606_v6 = vadd.f32 %v6758_v28, %v4472_v32  ;;  %v5574_v9 = vpop.f32.mrb[38].mxu1 }
 0x5f1   : > { %v4548_v11 = vadd.f32 %v5605_v4, %v6763_v18  ;;  %v5607_v12 = vadd.f32 %v5574_v9, %v6758_v28  ;;  %v4475_v13 = vpop.f32.mrb[39].mxu1 }
 0x5f2   : > { %v4546_v19 = vadd.f32 %v5606_v6, %v6763_v18  ;;  %v5608_v21 = vadd.f32 %v6758_v28, %v4475_v13 }
 0x5f3   : > { %v4564_v25 = vmax.f32 %v4548_v11, 0.0  ;;  %v4549_v22 = vadd.f32 %v5607_v12, %v6763_v18 }
 0x5f4   : > { %v4562_v24 = vmax.f32 %v4546_v19, 0.0  ;;  %v4547_v29 = vadd.f32 %v5608_v21, %v6763_v18 }
 0x5f5   : > { %4924 = vst.msk [vmem:[%s6775_s13 + $0xb0] sm:$0xff] %vm2685_vm5, %v4564_v25  ;;  %v4565_v26 = vmax.f32 %v4549_v22, 0.0 }
 0x5f6   : > { %4922 = vst.msk [vmem:[%s6775_s13 + $0xa0] sm:$0xff] %vm2685_vm5, %v4562_v24  ;;  %v4563_v40 = vmax.f32 %v4547_v29, 0.0  ;;  %v5577_v27 = vpop.f32.mrb[40].mxu1 }
 0x5f7   : > { %4925 = vst.msk [vmem:[%s6775_s13 + $0xb8] sm:$0xff] %vm2685_vm5, %v4565_v26  ;;  %v5609_v33 = vadd.f32 %v5577_v27, %v6758_v28  ;;  %v4488_v39 = vpop.f32.mrb[41].mxu1 }
 0x5f8   : > { %4923 = vst.msk [vmem:[%s6775_s13 + $0xa8] sm:$0xff] %vm2685_vm5, %v4563_v40  ;;  %v5610_v35 = vadd.f32 %v6758_v28, %v4488_v39  ;;  %v5578_v42 = vpop.f32.mrb[42].mxu1 }
 0x5f9   : > { %v4552_v38 = vadd.f32 %v5609_v33, %v6763_v18  ;;  %v5611_v37 = vadd.f32 %v5578_v42, %v6758_v28  ;;  %v4491_v44 = vpop.f32.mrb[43].mxu1 }
 0x5fa   : > { %v4550_v47 = vadd.f32 %v5610_v35, %v6763_v18  ;;  %v5612_v43 = vadd.f32 %v6758_v28, %v4491_v44 }
 0x5fb   : > { %v4568_v48 = vmax.f32 %v4552_v38, 0.0  ;;  %v4553_v59 = vadd.f32 %v5611_v37, %v6763_v18 }
 0x5fc   : > { %v4566_v45 = vmax.f32 %v4550_v47, 0.0  ;;  %v4551_v58 = vadd.f32 %v5612_v43, %v6763_v18 }
 0x5fd   : > { %4928 = vst.msk [vmem:[%s6775_s13 + $0xd0] sm:$0xff] %vm2685_vm5, %v4568_v48  ;;  %v4569_v10 = vmax.f32 %v4553_v59, 0.0 }
 0x5fe   : > { %4926 = vst.msk [vmem:[%s6775_s13 + $0xc0] sm:$0xff] %vm2685_vm5, %v4566_v45  ;;  %v4567_v14 = vmax.f32 %v4551_v58, 0.0  ;;  %v5581_v23 = vpop.f32.mrb[44].mxu1 }
 0x5ff   : > { %4929 = vst.msk [vmem:[%s6775_s13 + $0xd8] sm:$0xff] %vm2685_vm5, %v4569_v10  ;;  %v5613_v41 = vadd.f32 %v5581_v23, %v6758_v28  ;;  %v4504_v46 = vpop.f32.mrb[45].mxu1 }
 0x600   : > { %4927 = vst.msk [vmem:[%s6775_s13 + $0xc8] sm:$0xff] %vm2685_vm5, %v4567_v14  ;;  %v5614_v2 = vadd.f32 %v6758_v28, %v4504_v46  ;;  %v5582_v1 = vpop.f32.mrb[46].mxu1 }
 0x601   : > { %v4556_v51 = vadd.f32 %v5613_v41, %v6763_v18  ;;  %v5615_v7 = vadd.f32 %v5582_v1, %v6758_v28  ;;  %v4507_v8 = vpop.f32.mrb[47].mxu1 }
 0x602   : > { %v4554_v15 = vadd.f32 %v5614_v2, %v6763_v18  ;;  %v5616_v17 = vadd.f32 %v6758_v28, %v4507_v8 }
 0x603   : > { %v4572_v20 = vmax.f32 %v4556_v51, 0.0  ;;  %v4557_v50 = vadd.f32 %v5615_v7, %v6763_v18 }
 0x604   : > { %v4570_v30 = vmax.f32 %v4554_v15, 0.0  ;;  %v4555_v16 = vadd.f32 %v5616_v17, %v6763_v18 }
 0x605   : > { %4932 = vst.msk [vmem:[%s6775_s13 + $0xf0] sm:$0xff] %vm2685_vm5, %v4572_v20  ;;  %v4573_v53 = vmax.f32 %v4557_v50, 0.0 }
 0x606   : > { %4930 = vst.msk [vmem:[%s6775_s13 + $0xe0] sm:$0xff] %vm2685_vm5, %v4570_v30  ;;  %v4571_v55 = vmax.f32 %v4555_v16, 0.0 }
 0x607   : > { %4933 = vst.msk [vmem:[%s6775_s13 + $0xf8] sm:$0xff] %vm2685_vm5, %v4573_v53 }
 0x608   : > { %4931 = vst.msk [vmem:[%s6775_s13 + $0xe8] sm:$0xff] %vm2685_vm5, %v4571_v55 }
 0x609 PF: > { %s19_s30 = sadd.s32 1, %s5976_s30  }
 0x60a   : > { %p16_p4 = scmp.ge.s32.totalorder %s19_s30, 4  }
 0x60c   :  { %18 = sbr.rel (!%p16_p4) target bundleno = 1 (0x1), region = 101 }

</bundles_post_ra>
